<compile_context>
chip_gen: v6e
topology: v6e:2x2x1
jax: 0.10.0
libtpu: 0.0.40
codegen_flags: <defaults>
</compile_context>

<pallas_src>
import functools

import jax
import jax.numpy as jnp
from jax.experimental import pallas as pl
from jax.experimental.pallas import tpu as pltpu

_REDUCTION_MODES = ('none', 'mean', 'sum')
_EPS = 1e-8
_BUDGET_ELEMS = 256 * 1024  # ~1 MiB of f32 per input tile (keeps VMEM bounded incl. v7x)


def _row_reduce(d, op):
    """Reduce a (TB, R, W') value over the plane/row axes only -> (1, 1, W').

    No lane (last-axis) collapse happens in the kernel hot loop; the final lane
    reduction is done once in the wrapper on a tiny array.
    """
    r = op(d, axis=1, keepdims=True)      # (TB, 1, W')
    return op(r, axis=0, keepdims=True)   # (1, 1, W')


def _fold(ref, row, val, op):
    """Elementwise-fold a (1,1,W') partial into row `row` of a (1,4,W') output block."""
    cur = ref[0:1, row:row + 1, :]
    ref[0:1, row:row + 1, :] = op(cur, val)


def _stats_kernel(x_ref, y_ref, stats_h_ref, stats_w_ref, cx_ref, cy_ref,
                  *, num_h_tiles):
    """Pass 1: per-plane-block, lane-shaped running min/max of the four TV tensors."""
    t = pl.program_id(1)                               # row-tile index (sequential)

    x = x_ref[...].astype(jnp.float32)                 # (TB, TH, W)
    y = y_ref[...].astype(jnp.float32)
    wd = x.shape[-1]

    @pl.when(t == 0)
    def _init():
        pinf = jnp.full((1, 1, wd), jnp.inf, jnp.float32)
        pinf_w = jnp.full((1, 1, wd - 1), jnp.inf, jnp.float32)
        stats_h_ref[0:1, 0:1, :] = pinf        # min h_tv(illu)
        stats_h_ref[0:1, 1:2, :] = -pinf       # max h_tv(illu)
        stats_h_ref[0:1, 2:3, :] = pinf        # min h_tv(illu_gt)
        stats_h_ref[0:1, 3:4, :] = -pinf       # max h_tv(illu_gt)
        stats_w_ref[0:1, 0:1, :] = pinf_w
        stats_w_ref[0:1, 1:2, :] = -pinf_w
        stats_w_ref[0:1, 2:3, :] = pinf_w
        stats_w_ref[0:1, 3:4, :] = -pinf_w

    # Within-tile TV diffs.
    h_x = x[:, 1:, :] - x[:, :-1, :]                   # (TB, TH-1, W)
    h_y = y[:, 1:, :] - y[:, :-1, :]
    w_x = x[:, :, 1:] - x[:, :, :-1]                   # (TB, TH, W-1)
    w_y = y[:, :, 1:] - y[:, :, :-1]

    _fold(stats_h_ref, 0, _row_reduce(h_x, jnp.min), jnp.minimum)
    _fold(stats_h_ref, 1, _row_reduce(h_x, jnp.max), jnp.maximum)
    _fold(stats_h_ref, 2, _row_reduce(h_y, jnp.min), jnp.minimum)
    _fold(stats_h_ref, 3, _row_reduce(h_y, jnp.max), jnp.maximum)
    _fold(stats_w_ref, 0, _row_reduce(w_x, jnp.min), jnp.minimum)
    _fold(stats_w_ref, 1, _row_reduce(w_x, jnp.max), jnp.maximum)
    _fold(stats_w_ref, 2, _row_reduce(w_y, jnp.min), jnp.minimum)
    _fold(stats_w_ref, 3, _row_reduce(w_y, jnp.max), jnp.maximum)

    if num_h_tiles > 1:
        # Halo: row-diff between this tile's first row and the previous tile's last row.
        @pl.when(t > 0)
        def _halo():
            bx = x[:, 0:1, :] - cx_ref[...]            # (TB, 1, W)
            by = y[:, 0:1, :] - cy_ref[...]
            _fold(stats_h_ref, 0, _row_reduce(bx, jnp.min), jnp.minimum)
            _fold(stats_h_ref, 1, _row_reduce(bx, jnp.max), jnp.maximum)
            _fold(stats_h_ref, 2, _row_reduce(by, jnp.min), jnp.minimum)
            _fold(stats_h_ref, 3, _row_reduce(by, jnp.max), jnp.maximum)

        th = x.shape[1]
        cx_ref[...] = x[:, th - 1:th, :]               # carry last row for next tile
        cy_ref[...] = y[:, th - 1:th, :]


def _loss_kernel(consts_ref, x_ref, y_ref, hsum_ref, wsum_ref, cx_ref, cy_ref,
                 *, num_h_tiles):
    """Pass 2: accumulate sum(u*exp(u)) with u = d_x*a + d_g*b + c (scalars from SMEM)."""
    t = pl.program_id(1)

    x = x_ref[...].astype(jnp.float32)                 # (TB, TH, W)
    y = y_ref[...].astype(jnp.float32)

    a_h = consts_ref[0]
    b_h = consts_ref[1]
    c_h = consts_ref[2]
    a_w = consts_ref[3]
    b_w = consts_ref[4]
    c_w = consts_ref[5]

    @pl.when(t == 0)
    def _init():
        hsum_ref[...] = jnp.zeros(hsum_ref.shape, jnp.float32)
        wsum_ref[...] = jnp.zeros(wsum_ref.shape, jnp.float32)

    h_x = x[:, 1:, :] - x[:, :-1, :]
    h_y = y[:, 1:, :] - y[:, :-1, :]
    w_x = x[:, :, 1:] - x[:, :, :-1]
    w_y = y[:, :, 1:] - y[:, :, :-1]

    u_h = h_x * a_h + h_y * b_h + c_h                  # u = -10 * normalized-sum
    u_w = w_x * a_w + w_y * b_w + c_w
    hsum_ref[...] += _row_reduce(u_h * jnp.exp(u_h), jnp.sum)
    wsum_ref[...] += _row_reduce(u_w * jnp.exp(u_w), jnp.sum)

    if num_h_tiles > 1:
        @pl.when(t > 0)
        def _halo():
            bx = x[:, 0:1, :] - cx_ref[...]
            by = y[:, 0:1, :] - cy_ref[...]
            u_b = bx * a_h + by * b_h + c_h
            hsum_ref[...] += _row_reduce(u_b * jnp.exp(u_b), jnp.sum)

        th = x.shape[1]
        cx_ref[...] = x[:, th - 1:th, :]
        cy_ref[...] = y[:, th - 1:th, :]


def _choose_tiles(nb, h, w, tile_rows=None, planes_per_block=None):
    """Pick (planes_per_block TB, rows_per_tile TH) so per-tile VMEM use is bounded."""
    if tile_rows is not None:
        th = int(tile_rows)
        if h % th != 0 or (th != h and th % 8 != 0):
            raise ValueError('tile_rows must divide H and be a multiple of 8 (or equal H)')
    elif h * w <= _BUDGET_ELEMS:
        th = h
    else:
        start = min(max(8, (_BUDGET_ELEMS // w) // 8 * 8), (h // 8) * 8)
        th = next((c for c in range(start, 0, -8) if h % c == 0), None)
        if th is None:
            # TODO(synk): H has no multiple-of-8 divisor under the row budget; fall back to
            # whole-plane tiles (VMEM then scales with H*W).
            th = h

    if planes_per_block is not None:
        tb = int(planes_per_block)
        if nb % tb != 0:
            raise ValueError('planes_per_block must divide N*C')
    elif th < h:
        tb = 1
    else:
        tb_max = max(1, _BUDGET_ELEMS // (h * w))
        tb = next((c for c in range(min(tb_max, nb), 0, -1) if nb % c == 0), 1)
    return tb, th


def illu_mutual_loss(illu, illu_gt, loss_weight=1.0, reduction='mean', weight=None,
                     *, tile_rows=None, planes_per_block=None):
    if reduction not in _REDUCTION_MODES:
        raise ValueError(f'Unsupported reduction mode: {reduction}. '
                         f'Supported ones are: {list(_REDUCTION_MODES)}')
    # NOTE: the reference PyTorch forward() ignores `reduction` and `weight` and always
    # returns the mean-based scalar loss; we mirror that behavior exactly.
    del weight

    if illu.shape != illu_gt.shape:
        raise ValueError('illu and illu_gt must have the same shape')
    n, c, h, w = illu.shape
    if h < 2 or w < 2:
        raise ValueError('illuMutualLoss requires H >= 2 and W >= 2')

    nb = n * c
    x = illu.reshape(nb, h, w)        # contiguous NCHW reshape: free, keeps input dtype
    y = illu_gt.reshape(nb, h, w)

    tb, th = _choose_tiles(nb, h, w, tile_rows, planes_per_block)
    nbp, nht = nb // tb, h // th
    grid = (nbp, nht)

    in_block = pl.BlockSpec((tb, th, w), lambda i, t: (i, t, 0))
    cparams = pltpu.CompilerParams(
        dimension_semantics=("parallel", "arbitrary"),   # planes parallel, row-tiles serial
        vmem_limit_bytes=48 * 1024 * 1024,
    )

    # ----- pass 1: global min/max of the four TV tensors -------------------------------
    stats_h, stats_w = pl.pallas_call(
        functools.partial(_stats_kernel, num_h_tiles=nht),
        out_shape=(jax.ShapeDtypeStruct((nbp, 4, w), jnp.float32),
                   jax.ShapeDtypeStruct((nbp, 4, w - 1), jnp.float32)),
        grid=grid,
        in_specs=[in_block, in_block],
        out_specs=(pl.BlockSpec((1, 4, w), lambda i, t: (i, 0, 0)),
                   pl.BlockSpec((1, 4, w - 1), lambda i, t: (i, 0, 0))),
        scratch_shapes=[pltpu.VMEM((tb, 1, w), jnp.float32),   # carry rows (halo)
                        pltpu.VMEM((tb, 1, w), jnp.float32)],
        compiler_params=cparams,
    )(x, y)

    # Final (tiny) lane collapses + scalar algebra happen once here, not per grid step.
    min_hx = jnp.min(stats_h[:, 0, :]); max_hx = jnp.max(stats_h[:, 1, :])
    min_hy = jnp.min(stats_h[:, 2, :]); max_hy = jnp.max(stats_h[:, 3, :])
    min_wx = jnp.min(stats_w[:, 0, :]); max_wx = jnp.max(stats_w[:, 1, :])
    min_wy = jnp.min(stats_w[:, 2, :]); max_wy = jnp.max(stats_w[:, 3, :])

    inv_hx = 1.0 / (max_hx - min_hx + _EPS)
    inv_hy = 1.0 / (max_hy - min_hy + _EPS)
    inv_wx = 1.0 / (max_wx - min_wx + _EPS)
    inv_wy = 1.0 / (max_wy - min_wy + _EPS)

    consts = jnp.stack([
        -10.0 * inv_hx, -10.0 * inv_hy, 10.0 * (min_hx * inv_hx + min_hy * inv_hy),
        -10.0 * inv_wx, -10.0 * inv_wy, 10.0 * (min_wx * inv_wx + min_wy * inv_wy),
    ]).astype(jnp.float32)

    # ----- pass 2: normalized mutual-TV loss --------------------------------------------
    hsum, wsum = pl.pallas_call(
        functools.partial(_loss_kernel, num_h_tiles=nht),
        out_shape=(jax.ShapeDtypeStruct((nbp, 1, w), jnp.float32),
                   jax.ShapeDtypeStruct((nbp, 1, w - 1), jnp.float32)),
        grid=grid,
        in_specs=[pl.BlockSpec(memory_space=pltpu.MemorySpace.SMEM),  # 6 scalars in SMEM
                  in_block, in_block],
        out_specs=(pl.BlockSpec((1, 1, w), lambda i, t: (i, 0, 0)),
                   pl.BlockSpec((1, 1, w - 1), lambda i, t: (i, 0, 0))),
        scratch_shapes=[pltpu.VMEM((tb, 1, w), jnp.float32),
                        pltpu.VMEM((tb, 1, w), jnp.float32)],
        compiler_params=cparams,
    )(consts, x, y)

    h_count = nb * (h - 1) * w
    w_count = nb * h * (w - 1)
    # sum(hs*exp(-10*hs)) = -0.1 * sum(u*exp(u)) with u = -10*hs.
    mut_loss = -0.1 * (jnp.sum(hsum) / h_count + jnp.sum(wsum) / w_count)
    return loss_weight * mut_loss


def _reference(illu, illu_gt, loss_weight=1.0):
    x = illu.astype(jnp.float32)
    y = illu_gt.astype(jnp.float32)
    eps = 1e-8

    def _norm(t):
        return (t - t.min()) / (t.max() - t.min() + eps)

    h_x = x[:, :, 1:, :] - x[:, :, :-1, :]
    w_x = x[:, :, :, 1:] - x[:, :, :, :-1]
    h_y = y[:, :, 1:, :] - y[:, :, :-1, :]
    w_y = y[:, :, :, 1:] - y[:, :, :, :-1]

    hs = _norm(h_x) + _norm(h_y)
    ws = _norm(w_x) + _norm(w_y)
    h_loss = hs * jnp.exp(-10.0 * hs)
    w_loss = ws * jnp.exp(-10.0 * ws)
    return loss_weight * (jnp.mean(h_loss) + jnp.mean(w_loss))


if __name__ == "__main__":
    key = jax.random.PRNGKey(0)
    k1, k2, k3, k4 = jax.random.split(key, 4)

    # Case 1: small planes -> multiple planes per block (TB > 1), single row tile.
    N, C, H, W = 2, 3, 16, 16
    illu = jax.random.uniform(k1, (N, C, H, W), dtype=jnp.float32)
    illu_gt = jax.random.uniform(k2, (N, C, H, W), dtype=jnp.float32)
    loss = jax.block_until_ready(illu_mutual_loss(illu, illu_gt, loss_weight=1.0))
    ref = _reference(illu, illu_gt, loss_weight=1.0)
    assert jnp.allclose(loss, ref, rtol=1e-4, atol=1e-6), (loss, ref)

    # Case 2: force row tiling (exercises the halo-carry path): H=32 -> two 16-row tiles.
    H2 = 32
    illu2 = jax.random.uniform(k3, (1, 2, H2, W), dtype=jnp.float32)
    illu2_gt = jax.random.uniform(k4, (1, 2, H2, W), dtype=jnp.float32)
    loss2 = jax.block_until_ready(illu_mutual_loss(illu2, illu2_gt, tile_rows=16))
    ref2 = _reference(illu2, illu2_gt)
    assert jnp.allclose(loss2, ref2, rtol=1e-4, atol=1e-6), (loss2, ref2)

    print("KERNEL_OK")
</pallas_src>

<mosaic_0001>
module attributes {stable_mosaic.version = 11 : i64} {
  func.func @_stats_kernel(%arg0: i32, %arg1: i32, %arg2: memref<6x16x16xf32, #tpu.memory_space<vmem>>, %arg3: memref<6x16x16xf32, #tpu.memory_space<vmem>>, %arg4: memref<1x4x16xf32, #tpu.memory_space<vmem>>, %arg5: memref<1x4x15xf32, #tpu.memory_space<vmem>>, %arg6: memref<6x1x16xf32, #tpu.memory_space<vmem>>, %arg7: memref<6x1x16xf32, #tpu.memory_space<vmem>>) attributes {dimension_semantics = [#tpu.dimension_semantics<parallel>, #tpu.dimension_semantics<arbitrary>], iteration_bounds = array<i64: 1, 1>, scalar_prefetch = 0 : i64, scratch_operands = 2 : i64, tpu.core_type = #tpu.core_type<tc>, window_params = [{transform_indices = @transform_0, window_bounds = array<i64: 6, 16, 16>}, {transform_indices = @transform_1, window_bounds = array<i64: 6, 16, 16>}, {transform_indices = @transform_2, window_bounds = array<i64: 1, 4, 16>}, {transform_indices = @transform_3, window_bounds = array<i64: 1, 4, 15>}]} {
    %c0 = arith.constant 0 : index
    %c0_0 = arith.constant 0 : index
    %c0_1 = arith.constant 0 : index
    %0 = vector.load %arg2[%c0, %c0_0, %c0_1] : memref<6x16x16xf32, #tpu.memory_space<vmem>>, vector<6x16x16xf32>
    %c0_2 = arith.constant 0 : index
    %c0_3 = arith.constant 0 : index
    %c0_4 = arith.constant 0 : index
    %1 = vector.load %arg3[%c0_2, %c0_3, %c0_4] : memref<6x16x16xf32, #tpu.memory_space<vmem>>, vector<6x16x16xf32>
    %c0_i32 = arith.constant 0 : i32
    %2 = arith.cmpi eq, %arg1, %c0_i32 : i32
    %3 = arith.extui %2 : i1 to i32
    %c0_i32_5 = arith.constant 0 : i32
    %4 = arith.cmpi ne, %3, %c0_i32_5 : i32
    scf.if %4 {
      %cst_66 = arith.constant 0x7F800000 : f32
      %73 = vector.broadcast %cst_66 : f32 to vector<1x1x16xf32>
      %cst_67 = arith.constant 0x7F800000 : f32
      %74 = vector.broadcast %cst_67 : f32 to vector<1x1x15xf32>
      %c0_68 = arith.constant 0 : index
      %c0_69 = arith.constant 0 : index
      %c0_70 = arith.constant 0 : index
      %75 = vector.load %arg4[%c0_68, %c0_69, %c0_70] : memref<1x4x16xf32, #tpu.memory_space<vmem>>, vector<1x1x16xf32>
      tpu.vector_store %arg4[%c0_68, %c0_69, %c0_70], %73 {strides = array<i32>} : memref<1x4x16xf32, #tpu.memory_space<vmem>>, vector<1x1x16xf32>,
      %cst_71 = arith.constant 0.000000e+00 : f32
      %76 = vector.broadcast %cst_71 : f32 to vector<1x1x16xf32>
      %77 = arith.subf %76, %73 : vector<1x1x16xf32>
      %c0_72 = arith.constant 0 : index
      %c1_73 = arith.constant 1 : index
      %c0_74 = arith.constant 0 : index
      %78 = vector.load %arg4[%c0_72, %c1_73, %c0_74] : memref<1x4x16xf32, #tpu.memory_space<vmem>>, vector<1x1x16xf32>
      tpu.vector_store %arg4[%c0_72, %c1_73, %c0_74], %77 {strides = array<i32>} : memref<1x4x16xf32, #tpu.memory_space<vmem>>, vector<1x1x16xf32>,
      %c0_75 = arith.constant 0 : index
      %c2_76 = arith.constant 2 : index
      %c0_77 = arith.constant 0 : index
      %79 = vector.load %arg4[%c0_75, %c2_76, %c0_77] : memref<1x4x16xf32, #tpu.memory_space<vmem>>, vector<1x1x16xf32>
      tpu.vector_store %arg4[%c0_75, %c2_76, %c0_77], %73 {strides = array<i32>} : memref<1x4x16xf32, #tpu.memory_space<vmem>>, vector<1x1x16xf32>,
      %cst_78 = arith.constant 0.000000e+00 : f32
      %80 = vector.broadcast %cst_78 : f32 to vector<1x1x16xf32>
      %81 = arith.subf %80, %73 : vector<1x1x16xf32>
      %c0_79 = arith.constant 0 : index
      %c3_80 = arith.constant 3 : index
      %c0_81 = arith.constant 0 : index
      %82 = vector.load %arg4[%c0_79, %c3_80, %c0_81] : memref<1x4x16xf32, #tpu.memory_space<vmem>>, vector<1x1x16xf32>
      tpu.vector_store %arg4[%c0_79, %c3_80, %c0_81], %81 {strides = array<i32>} : memref<1x4x16xf32, #tpu.memory_space<vmem>>, vector<1x1x16xf32>,
      %c0_82 = arith.constant 0 : index
      %c0_83 = arith.constant 0 : index
      %c0_84 = arith.constant 0 : index
      %83 = vector.load %arg5[%c0_82, %c0_83, %c0_84] : memref<1x4x15xf32, #tpu.memory_space<vmem>>, vector<1x1x15xf32>
      tpu.vector_store %arg5[%c0_82, %c0_83, %c0_84], %74 {strides = array<i32>} : memref<1x4x15xf32, #tpu.memory_space<vmem>>, vector<1x1x15xf32>,
      %cst_85 = arith.constant 0.000000e+00 : f32
      %84 = vector.broadcast %cst_85 : f32 to vector<1x1x15xf32>
      %85 = arith.subf %84, %74 : vector<1x1x15xf32>
      %c0_86 = arith.constant 0 : index
      %c1_87 = arith.constant 1 : index
      %c0_88 = arith.constant 0 : index
      %86 = vector.load %arg5[%c0_86, %c1_87, %c0_88] : memref<1x4x15xf32, #tpu.memory_space<vmem>>, vector<1x1x15xf32>
      tpu.vector_store %arg5[%c0_86, %c1_87, %c0_88], %85 {strides = array<i32>} : memref<1x4x15xf32, #tpu.memory_space<vmem>>, vector<1x1x15xf32>,
      %c0_89 = arith.constant 0 : index
      %c2_90 = arith.constant 2 : index
      %c0_91 = arith.constant 0 : index
      %87 = vector.load %arg5[%c0_89, %c2_90, %c0_91] : memref<1x4x15xf32, #tpu.memory_space<vmem>>, vector<1x1x15xf32>
      tpu.vector_store %arg5[%c0_89, %c2_90, %c0_91], %74 {strides = array<i32>} : memref<1x4x15xf32, #tpu.memory_space<vmem>>, vector<1x1x15xf32>,
      %cst_92 = arith.constant 0.000000e+00 : f32
      %88 = vector.broadcast %cst_92 : f32 to vector<1x1x15xf32>
      %89 = arith.subf %88, %74 : vector<1x1x15xf32>
      %c0_93 = arith.constant 0 : index
      %c3_94 = arith.constant 3 : index
      %c0_95 = arith.constant 0 : index
      %90 = vector.load %arg5[%c0_93, %c3_94, %c0_95] : memref<1x4x15xf32, #tpu.memory_space<vmem>>, vector<1x1x15xf32>
      tpu.vector_store %arg5[%c0_93, %c3_94, %c0_95], %89 {strides = array<i32>} : memref<1x4x15xf32, #tpu.memory_space<vmem>>, vector<1x1x15xf32>,
    } else {
    }
    %5 = vector.extract_strided_slice %0 {offsets = [0, 1, 0], sizes = [6, 15, 16], strides = [1, 1, 1]} : vector<6x16x16xf32> to vector<6x15x16xf32>
    %6 = vector.extract_strided_slice %0 {offsets = [0, 0, 0], sizes = [6, 15, 16], strides = [1, 1, 1]} : vector<6x16x16xf32> to vector<6x15x16xf32>
    %7 = arith.subf %5, %6 : vector<6x15x16xf32>
    %8 = vector.extract_strided_slice %1 {offsets = [0, 1, 0], sizes = [6, 15, 16], strides = [1, 1, 1]} : vector<6x16x16xf32> to vector<6x15x16xf32>
    %9 = vector.extract_strided_slice %1 {offsets = [0, 0, 0], sizes = [6, 15, 16], strides = [1, 1, 1]} : vector<6x16x16xf32> to vector<6x15x16xf32>
    %10 = arith.subf %8, %9 : vector<6x15x16xf32>
    %11 = vector.extract_strided_slice %0 {offsets = [0, 0, 1], sizes = [6, 16, 15], strides = [1, 1, 1]} : vector<6x16x16xf32> to vector<6x16x15xf32>
    %12 = vector.extract_strided_slice %0 {offsets = [0, 0, 0], sizes = [6, 16, 15], strides = [1, 1, 1]} : vector<6x16x16xf32> to vector<6x16x15xf32>
    %13 = arith.subf %11, %12 : vector<6x16x15xf32>
    %14 = vector.extract_strided_slice %1 {offsets = [0, 0, 1], sizes = [6, 16, 15], strides = [1, 1, 1]} : vector<6x16x16xf32> to vector<6x16x15xf32>
    %15 = vector.extract_strided_slice %1 {offsets = [0, 0, 0], sizes = [6, 16, 15], strides = [1, 1, 1]} : vector<6x16x16xf32> to vector<6x16x15xf32>
    %16 = arith.subf %14, %15 : vector<6x16x15xf32>
    %cst = arith.constant dense<0x7F800000> : vector<6x16xf32>
    %17 = vector.multi_reduction <minimumf>, %7, %cst [1] : vector<6x15x16xf32> to vector<6x16xf32>
    %18 = vector.shape_cast %17 : vector<6x16xf32> to vector<6x1x16xf32>
    %cst_6 = arith.constant dense<0x7F800000> : vector<1x16xf32>
    %19 = vector.multi_reduction <minimumf>, %18, %cst_6 [0] : vector<6x1x16xf32> to vector<1x16xf32>
    %20 = vector.shape_cast %19 : vector<1x16xf32> to vector<1x1x16xf32>
    %c0_7 = arith.constant 0 : index
    %c0_8 = arith.constant 0 : index
    %c0_9 = arith.constant 0 : index
    %21 = vector.load %arg4[%c0_7, %c0_8, %c0_9] : memref<1x4x16xf32, #tpu.memory_space<vmem>>, vector<1x1x16xf32>
    %22 = arith.minimumf %21, %20 : vector<1x1x16xf32>
    %c0_10 = arith.constant 0 : index
    %c0_11 = arith.constant 0 : index
    %c0_12 = arith.constant 0 : index
    %23 = vector.load %arg4[%c0_10, %c0_11, %c0_12] : memref<1x4x16xf32, #tpu.memory_space<vmem>>, vector<1x1x16xf32>
    tpu.vector_store %arg4[%c0_10, %c0_11, %c0_12], %22 {strides = array<i32>} : memref<1x4x16xf32, #tpu.memory_space<vmem>>, vector<1x1x16xf32>,
    %cst_13 = arith.constant dense<0xFF800000> : vector<6x16xf32>
    %24 = vector.multi_reduction <maximumf>, %7, %cst_13 [1] : vector<6x15x16xf32> to vector<6x16xf32>
    %25 = vector.shape_cast %24 : vector<6x16xf32> to vector<6x1x16xf32>
    %cst_14 = arith.constant dense<0xFF800000> : vector<1x16xf32>
    %26 = vector.multi_reduction <maximumf>, %25, %cst_14 [0] : vector<6x1x16xf32> to vector<1x16xf32>
    %27 = vector.shape_cast %26 : vector<1x16xf32> to vector<1x1x16xf32>
    %c0_15 = arith.constant 0 : index
    %c1 = arith.constant 1 : index
    %c0_16 = arith.constant 0 : index
    %28 = vector.load %arg4[%c0_15, %c1, %c0_16] : memref<1x4x16xf32, #tpu.memory_space<vmem>>, vector<1x1x16xf32>
    %29 = arith.maximumf %28, %27 : vector<1x1x16xf32>
    %c0_17 = arith.constant 0 : index
    %c1_18 = arith.constant 1 : index
    %c0_19 = arith.constant 0 : index
    %30 = vector.load %arg4[%c0_17, %c1_18, %c0_19] : memref<1x4x16xf32, #tpu.memory_space<vmem>>, vector<1x1x16xf32>
    tpu.vector_store %arg4[%c0_17, %c1_18, %c0_19], %29 {strides = array<i32>} : memref<1x4x16xf32, #tpu.memory_space<vmem>>, vector<1x1x16xf32>,
    %cst_20 = arith.constant dense<0x7F800000> : vector<6x16xf32>
    %31 = vector.multi_reduction <minimumf>, %10, %cst_20 [1] : vector<6x15x16xf32> to vector<6x16xf32>
    %32 = vector.shape_cast %31 : vector<6x16xf32> to vector<6x1x16xf32>
    %cst_21 = arith.constant dense<0x7F800000> : vector<1x16xf32>
    %33 = vector.multi_reduction <minimumf>, %32, %cst_21 [0] : vector<6x1x16xf32> to vector<1x16xf32>
    %34 = vector.shape_cast %33 : vector<1x16xf32> to vector<1x1x16xf32>
    %c0_22 = arith.constant 0 : index
    %c2 = arith.constant 2 : index
    %c0_23 = arith.constant 0 : index
    %35 = vector.load %arg4[%c0_22, %c2, %c0_23] : memref<1x4x16xf32, #tpu.memory_space<vmem>>, vector<1x1x16xf32>
    %36 = arith.minimumf %35, %34 : vector<1x1x16xf32>
    %c0_24 = arith.constant 0 : index
    %c2_25 = arith.constant 2 : index
    %c0_26 = arith.constant 0 : index
    %37 = vector.load %arg4[%c0_24, %c2_25, %c0_26] : memref<1x4x16xf32, #tpu.memory_space<vmem>>, vector<1x1x16xf32>
    tpu.vector_store %arg4[%c0_24, %c2_25, %c0_26], %36 {strides = array<i32>} : memref<1x4x16xf32, #tpu.memory_space<vmem>>, vector<1x1x16xf32>,
    %cst_27 = arith.constant dense<0xFF800000> : vector<6x16xf32>
    %38 = vector.multi_reduction <maximumf>, %10, %cst_27 [1] : vector<6x15x16xf32> to vector<6x16xf32>
    %39 = vector.shape_cast %38 : vector<6x16xf32> to vector<6x1x16xf32>
    %cst_28 = arith.constant dense<0xFF800000> : vector<1x16xf32>
    %40 = vector.multi_reduction <maximumf>, %39, %cst_28 [0] : vector<6x1x16xf32> to vector<1x16xf32>
    %41 = vector.shape_cast %40 : vector<1x16xf32> to vector<1x1x16xf32>
    %c0_29 = arith.constant 0 : index
    %c3 = arith.constant 3 : index
    %c0_30 = arith.constant 0 : index
    %42 = vector.load %arg4[%c0_29, %c3, %c0_30] : memref<1x4x16xf32, #tpu.memory_space<vmem>>, vector<1x1x16xf32>
    %43 = arith.maximumf %42, %41 : vector<1x1x16xf32>
    %c0_31 = arith.constant 0 : index
    %c3_32 = arith.constant 3 : index
    %c0_33 = arith.constant 0 : index
    %44 = vector.load %arg4[%c0_31, %c3_32, %c0_33] : memref<1x4x16xf32, #tpu.memory_space<vmem>>, vector<1x1x16xf32>
    tpu.vector_store %arg4[%c0_31, %c3_32, %c0_33], %43 {strides = array<i32>} : memref<1x4x16xf32, #tpu.memory_space<vmem>>, vector<1x1x16xf32>,
    %cst_34 = arith.constant dense<0x7F800000> : vector<6x15xf32>
    %45 = vector.multi_reduction <minimumf>, %13, %cst_34 [1] : vector<6x16x15xf32> to vector<6x15xf32>
    %46 = vector.shape_cast %45 : vector<6x15xf32> to vector<6x1x15xf32>
    %cst_35 = arith.constant dense<0x7F800000> : vector<1x15xf32>
    %47 = vector.multi_reduction <minimumf>, %46, %cst_35 [0] : vector<6x1x15xf32> to vector<1x15xf32>
    %48 = vector.shape_cast %47 : vector<1x15xf32> to vector<1x1x15xf32>
    %c0_36 = arith.constant 0 : index
    %c0_37 = arith.constant 0 : index
    %c0_38 = arith.constant 0 : index
    %49 = vector.load %arg5[%c0_36, %c0_37, %c0_38] : memref<1x4x15xf32, #tpu.memory_space<vmem>>, vector<1x1x15xf32>
    %50 = arith.minimumf %49, %48 : vector<1x1x15xf32>
    %c0_39 = arith.constant 0 : index
    %c0_40 = arith.constant 0 : index
    %c0_41 = arith.constant 0 : index
    %51 = vector.load %arg5[%c0_39, %c0_40, %c0_41] : memref<1x4x15xf32, #tpu.memory_space<vmem>>, vector<1x1x15xf32>
    tpu.vector_store %arg5[%c0_39, %c0_40, %c0_41], %50 {strides = array<i32>} : memref<1x4x15xf32, #tpu.memory_space<vmem>>, vector<1x1x15xf32>,
    %cst_42 = arith.constant dense<0xFF800000> : vector<6x15xf32>
    %52 = vector.multi_reduction <maximumf>, %13, %cst_42 [1] : vector<6x16x15xf32> to vector<6x15xf32>
    %53 = vector.shape_cast %52 : vector<6x15xf32> to vector<6x1x15xf32>
    %cst_43 = arith.constant dense<0xFF800000> : vector<1x15xf32>
    %54 = vector.multi_reduction <maximumf>, %53, %cst_43 [0] : vector<6x1x15xf32> to vector<1x15xf32>
    %55 = vector.shape_cast %54 : vector<1x15xf32> to vector<1x1x15xf32>
    %c0_44 = arith.constant 0 : index
    %c1_45 = arith.constant 1 : index
    %c0_46 = arith.constant 0 : index
    %56 = vector.load %arg5[%c0_44, %c1_45, %c0_46] : memref<1x4x15xf32, #tpu.memory_space<vmem>>, vector<1x1x15xf32>
    %57 = arith.maximumf %56, %55 : vector<1x1x15xf32>
    %c0_47 = arith.constant 0 : index
    %c1_48 = arith.constant 1 : index
    %c0_49 = arith.constant 0 : index
    %58 = vector.load %arg5[%c0_47, %c1_48, %c0_49] : memref<1x4x15xf32, #tpu.memory_space<vmem>>, vector<1x1x15xf32>
    tpu.vector_store %arg5[%c0_47, %c1_48, %c0_49], %57 {strides = array<i32>} : memref<1x4x15xf32, #tpu.memory_space<vmem>>, vector<1x1x15xf32>,
    %cst_50 = arith.constant dense<0x7F800000> : vector<6x15xf32>
    %59 = vector.multi_reduction <minimumf>, %16, %cst_50 [1] : vector<6x16x15xf32> to vector<6x15xf32>
    %60 = vector.shape_cast %59 : vector<6x15xf32> to vector<6x1x15xf32>
    %cst_51 = arith.constant dense<0x7F800000> : vector<1x15xf32>
    %61 = vector.multi_reduction <minimumf>, %60, %cst_51 [0] : vector<6x1x15xf32> to vector<1x15xf32>
    %62 = vector.shape_cast %61 : vector<1x15xf32> to vector<1x1x15xf32>
    %c0_52 = arith.constant 0 : index
    %c2_53 = arith.constant 2 : index
    %c0_54 = arith.constant 0 : index
    %63 = vector.load %arg5[%c0_52, %c2_53, %c0_54] : memref<1x4x15xf32, #tpu.memory_space<vmem>>, vector<1x1x15xf32>
    %64 = arith.minimumf %63, %62 : vector<1x1x15xf32>
    %c0_55 = arith.constant 0 : index
    %c2_56 = arith.constant 2 : index
    %c0_57 = arith.constant 0 : index
    %65 = vector.load %arg5[%c0_55, %c2_56, %c0_57] : memref<1x4x15xf32, #tpu.memory_space<vmem>>, vector<1x1x15xf32>
    tpu.vector_store %arg5[%c0_55, %c2_56, %c0_57], %64 {strides = array<i32>} : memref<1x4x15xf32, #tpu.memory_space<vmem>>, vector<1x1x15xf32>,
    %cst_58 = arith.constant dense<0xFF800000> : vector<6x15xf32>
    %66 = vector.multi_reduction <maximumf>, %16, %cst_58 [1] : vector<6x16x15xf32> to vector<6x15xf32>
    %67 = vector.shape_cast %66 : vector<6x15xf32> to vector<6x1x15xf32>
    %cst_59 = arith.constant dense<0xFF800000> : vector<1x15xf32>
    %68 = vector.multi_reduction <maximumf>, %67, %cst_59 [0] : vector<6x1x15xf32> to vector<1x15xf32>
    %69 = vector.shape_cast %68 : vector<1x15xf32> to vector<1x1x15xf32>
    %c0_60 = arith.constant 0 : index
    %c3_61 = arith.constant 3 : index
    %c0_62 = arith.constant 0 : index
    %70 = vector.load %arg5[%c0_60, %c3_61, %c0_62] : memref<1x4x15xf32, #tpu.memory_space<vmem>>, vector<1x1x15xf32>
    %71 = arith.maximumf %70, %69 : vector<1x1x15xf32>
    %c0_63 = arith.constant 0 : index
    %c3_64 = arith.constant 3 : index
    %c0_65 = arith.constant 0 : index
    %72 = vector.load %arg5[%c0_63, %c3_64, %c0_65] : memref<1x4x15xf32, #tpu.memory_space<vmem>>, vector<1x1x15xf32>
    tpu.vector_store %arg5[%c0_63, %c3_64, %c0_65], %71 {strides = array<i32>} : memref<1x4x15xf32, #tpu.memory_space<vmem>>, vector<1x1x15xf32>,
    return
  }
  func.func @transform_0(%arg0: i32, %arg1: i32) -> (i32, i32, i32) {
    %c0_i32 = arith.constant 0 : i32
    %c0_i32_0 = arith.constant 0 : i32
    return %arg0, %arg1, %c0_i32 : i32, i32, i32
  }
  func.func @transform_1(%arg0: i32, %arg1: i32) -> (i32, i32, i32) {
    %c0_i32 = arith.constant 0 : i32
    %c0_i32_0 = arith.constant 0 : i32
    return %arg0, %arg1, %c0_i32 : i32, i32, i32
  }
  func.func @transform_2(%arg0: i32, %arg1: i32) -> (i32, i32, i32) {
    %c0_i32 = arith.constant 0 : i32
    %c0_i32_0 = arith.constant 0 : i32
    %c0_i32_1 = arith.constant 0 : i32
    return %arg0, %c0_i32, %c0_i32_0 : i32, i32, i32
  }
  func.func @transform_3(%arg0: i32, %arg1: i32) -> (i32, i32, i32) {
    %c0_i32 = arith.constant 0 : i32
    %c0_i32_0 = arith.constant 0 : i32
    %c0_i32_1 = arith.constant 0 : i32
    return %arg0, %c0_i32, %c0_i32_0 : i32, i32, i32
  }
}

</mosaic_0001>

<bundles_post_ra>
// kernel: tpu_custom_call.1
= control target key start
LH: loop header
LB: loop body
LE: loop exit
PB: predicated region body
PF: predicated region fallthrough
CT: control target
= control target key end

     0   :  { %9 = vsyncpa [#allocation5], 0  ;;  %s1536_s0 = inlined_call_operand.hbm [shape: f32[6,16,16], index: 0, kind: input, shape index: {}]   ;;  %s1537_s1 = inlined_call_operand.hbm [shape: f32[6,16,16], index: 1, kind: input, shape index: {}]   ;;  %s1538_s2 = inlined_call_operand.hbm [shape: f32[1,4,16], index: 2, kind: output, shape index: {0}]   ;;  %s1539_s3 = inlined_call_operand.hbm [shape: f32[1,4,15], index: 3, kind: output, shape index: {1}]  }
   0x1   :  { %10 = vsyncpa [#allocation8], 0 }
   0x2   :  { %11 = vsyncpa [#allocation6], 0 }
   0x3   :  { %12 = vsyncpa [#allocation11], 0  ;;  %s979_s12 = smov [#allocation4]  }
   0x4   :  { %s18_s13 = sshll.u32 %s979_s12, 4  ;;  %s19_s13 = int_to_ptr.vmem [resolvable:$true] %s18_s13 }
   0x5   :  { %s899_s14 = scalar_lea.vmem %s19_s13, 1536  ;;  %p904_p1 = scmp.lt.s32.totalorder %s19_s13, %s19_s13 }
   0x6   :  { %p900_p0 = scmp.ne.s32.totalorder %s19_s13, %s899_s14  ;;  %p905_p2 = scmp.lt.s32.totalorder %s899_s14, %s899_s14 }
   0x8   :  { %p906_p3 = por %p905_p2, %p904_p1 }
   0xa   :  { %p907_p4 = pnand %p906_p3, %p900_p0 }
   0xc   :  { %910 = shalt.err (!%p907_p4)
}
   0xd   :  { %s980_s15 = smov 128   ;;  %s981_s16 = smov 8  }
   0xe   :  { %24 = dma.hbm_to_vmem [thread:$0]  %s1536_s0, 1536, %s19_s13, [#allocation5], %s980_s15, %s980_s15, %s981_s16  }
   0xf   :  { %s982_s19 = smov [#allocation7]  }
  0x10   :  { %s30_s20 = sshll.u32 %s982_s19, 4  ;;  %s31_s20 = int_to_ptr.vmem [resolvable:$true] %s30_s20 }
  0x11   :  { %s919_s21 = scalar_lea.vmem %s31_s20, 1536  ;;  %p924_p6 = scmp.lt.s32.totalorder %s31_s20, %s31_s20 }
  0x12   :  { %p920_p5 = scmp.ne.s32.totalorder %s31_s20, %s919_s21  ;;  %p925_p7 = scmp.lt.s32.totalorder %s919_s21, %s919_s21 }
  0x14   :  { %p926_p8 = por %p925_p7, %p924_p6 }
  0x16   :  { %p927_p9 = pnand %p926_p8, %p920_p5 }
  0x18   :  { %930 = shalt.err (!%p927_p9)
}
  0x19   :  { %36 = dma.hbm_to_vmem [thread:$0]  %s1537_s1, 1536, %s31_s20, [#allocation8], %s980_s15, %s980_s15, %s981_s16  }
  0x1a   :  { %971 = dma.done.wait [#allocation5], 1536  }
  0x1b   :  { %972 = vsyncadd [#allocation5], 4294965760 }
  0x1c   :  { %973 = dma.done.wait [#allocation8], 1536  }
  0x1d   :  { %974 = vsyncadd [#allocation8], 4294965760  ;;  %v1015_v0 = vld [vmem:[#allocation4 + $0x10] sm:$0xff]  ;;  %v1017_v1 = vld [vmem:[#allocation4] sm:$0xff]  ;;  %s983_s0 = smov 1   ;;  %vm93_vm0 = vcmask 1040384  }
  0x1e   :  { %194 = vrot.lane.b32.xlu1 %v1015_v0, %s983_s0  ;;  %190 = vrot.lane.b32.xlu0 %v1017_v1, %s983_s0  ;;  %v1023_v2 = vld [vmem:[#allocation4 + $0x18] sm:$0xff]  ;;  %v1025_v3 = vld [vmem:[#allocation4 + $0x8] sm:$0xff]  ;;  %v1033_v5 = vld [vmem:[#allocation4 + $0x40] sm:$0xff]  ;;  %v97_v14 = vrot.slane %v1015_v0, 7  ;;  %v94_v16 = vrot.slane %v1017_v1, 7  ;;  %vm286_vm1 = vcmask 130049  }
  0x1f   :  { %v1031_v4 = vld [vmem:[#allocation4 + $0x48] sm:$0xff]  ;;  %v1039_v6 = vld [vmem:[#allocation4 + $0x58] sm:$0xff]  ;;  %v1041_v7 = vld [vmem:[#allocation4 + $0x50] sm:$0xff]  ;;  %v98_v15 = vrot.slane %v1023_v2, 7  ;;  %v95_v17 = vrot.slane %v1025_v3, 7  ;;  %v106_v19 = vrot.slane %v1033_v5, 7 }
  0x20   :  { %v1047_v8 = vld [vmem:[#allocation7 + $0x8] sm:$0xff]  ;;  %v1049_v9 = vld [vmem:[#allocation7] sm:$0xff]  ;;  %v1055_v10 = vld [vmem:[#allocation7 + $0x18] sm:$0xff]  ;;  %v107_v18 = vrot.slane %v1031_v4, 7  ;;  %v126_v26 = vsub.f32 %v1015_v0, %v97_v14  ;;  %v124_v27 = vsub.f32 %v1017_v1, %v94_v16  ;;  %vm288_vm2 = vcmask 130048   ;;  %s985_s1 = smov 127  }
  0x21   :  { %v1057_v11 = vld [vmem:[#allocation7 + $0x10] sm:$0xff]  ;;  %v1063_v12 = vld [vmem:[#allocation7 + $0x48] sm:$0xff]  ;;  %v1065_v13 = vld [vmem:[#allocation7 + $0x40] sm:$0xff]  ;;  %v99_v22 = vsel %vm93_vm0, %v97_v14, %v98_v15  ;;  %v96_v23 = vsel %vm93_vm0, %v94_v16, %v95_v17  ;;  %v132_v31 = vsub.f32 %v1033_v5, %v106_v19  ;;  %v110_v33 = vrot.slane %v1039_v6, 7  ;;  %s987_s24 = smov [#allocation9]  }
  0x22   :  { %196 = vrot.lane.b32.xlu1 %v1023_v2, %s983_s0  ;;  %192 = vrot.lane.b32.xlu0 %v1025_v3, %s983_s0  ;;  %1562 = vst [vmem:[#allocation16_spill] sm:$0xff] %v1057_v11  ;;  %1563 = vst [vmem:[#allocation17_spill] sm:$0xff] %v1063_v12  ;;  %v1077_v20 = vld [vmem:[#allocation7 + $0x58] sm:$0xff]  ;;  %v1079_v21 = vld [vmem:[#allocation7 + $0x50] sm:$0xff]  ;;  %v108_v24 = vsel %vm93_vm0, %v106_v19, %v107_v18  ;;  %v127_v28 = vsub.f32 %v1023_v2, %v99_v22  ;;  %v109_v34 = vrot.slane %v1041_v7, 7  ;;  %vm76_vm3 = vcmask 114688  }
  0x23   :  { %1564 = vst [vmem:[#allocation18_spill] sm:$0xff] %v1065_v13  ;;  %1565 = vst [vmem:[#allocation19_spill] sm:$0xff] %v1077_v20  ;;  %v1088_v25 = vld [vmem:[#allocation4 + $0x28] sm:$0xff]  ;;  %v1093_v29 = vld [vmem:[#allocation4 + $0x20] sm:$0xff]  ;;  %v125_v30 = vsub.f32 %v1025_v3, %v96_v23  ;;  %v133_v32 = vsub.f32 %v1031_v4, %v108_v24  ;;  %v297_v36 = vsel %vm286_vm1, %v126_v26, inf  ;;  %v287_v37 = vsel %vm286_vm1, %v124_v27, inf }
  0x24   :  { %1566 = vst [vmem:[#allocation20_spill] sm:$0xff] %v1079_v21  ;;  %1567 = vst [vmem:[#allocation21_spill] sm:$0xff] %v1088_v25  ;;  %v1104_v35 = vld [vmem:[#allocation4 + $0x38] sm:$0xff]  ;;  %v298_v38 = vsel %vm288_vm2, %v127_v28, inf  ;;  %v1109_v39 = vld [vmem:[#allocation4 + $0x30] sm:$0xff]  ;;  %v357_v40 = vsel %vm286_vm1, %v124_v27, -inf  ;;  %v111_v47 = vsel %vm93_vm0, %v109_v34, %v110_v33  ;;  %v134_v57 = vsub.f32 %v1041_v7, %v109_v34 }
  0x25   :  { %1568 = vst [vmem:[#allocation22_spill] sm:$0xff] %v1093_v29  ;;  %1569 = vst [vmem:[#allocation23_spill] sm:$0xff] %v1104_v35  ;;  %v289_v41 = vsel %vm288_vm2, %v125_v30, inf  ;;  %v358_v42 = vsel %vm288_vm2, %v125_v30, -inf  ;;  %v324_v43 = vsel %vm286_vm1, %v132_v31, inf  ;;  %v325_v44 = vsel %vm288_vm2, %v133_v32, inf }
  0x26   :  { %208 = vrot.lane.b32.xlu1 %v1031_v4, %s983_s0  ;;  %206 = vrot.lane.b32.xlu0 %v1033_v5, %s983_s0  ;;  %1570 = vst [vmem:[#allocation24_spill] sm:$0xff] %v1109_v39  ;;  %v393_v45 = vsel %vm286_vm1, %v132_v31, -inf  ;;  %v394_v46 = vsel %vm288_vm2, %v133_v32, -inf  ;;  %v366_v48 = vsel %vm286_vm1, %v126_v26, -inf  ;;  %v299_v49 = vmin.f32 %v297_v36, %v298_v38  ;;  %v1125_v51 = vld [vmem:[#allocation7 + $0x28] sm:$0xff]  ;;  %v1127_v54 = vld [vmem:[#allocation7 + $0x20] sm:$0xff] }
  0x27   :  { %v367_v50 = vsel %vm288_vm2, %v127_v28, -inf  ;;  %1571 = vst [vmem:[#allocation25_spill] sm:$0xff] %v1125_v51  ;;  %v290_v52 = vmin.f32 %v287_v37, %v289_v41  ;;  %v359_v53 = vmax.f32 %v357_v40, %v358_v42  ;;  %1572 = vst [vmem:[#allocation26_spill] sm:$0xff] %v1127_v54  ;;  %v326_v55 = vmin.f32 %v324_v43, %v325_v44  ;;  %v1135_v61 = vld [vmem:[#allocation7 + $0x38] sm:$0xff]  ;;  %v1137_v14 = vld [vmem:[#allocation7 + $0x30] sm:$0xff]  ;;  %s857_s25 = sshll.u32 %s987_s24, 4  ;;  %s858_s25 = int_to_ptr.vmem [resolvable:$true] %s857_s25 }
  0x28   :  { %v395_v56 = vmax.f32 %v393_v45, %v394_v46  ;;  %v135_v58 = vsub.f32 %v1039_v6, %v111_v47  ;;  %v368_v59 = vmax.f32 %v366_v48, %v367_v50  ;;  %v300_v60 = vrot.slane %v299_v49, 4  ;;  %1573 = vst [vmem:[#allocation27_spill] sm:$0xff] %v1135_v61  ;;  %1574 = vst [vmem:[#allocation28_spill] sm:$0xff] %v1137_v14  ;;  %s931_s26 = scalar_lea.vmem %s858_s25, 64  ;;  %p936_p11 = scmp.lt.s32.totalorder %s858_s25, %s858_s25 }
  0x29   :  { %v291_v62 = vrot.slane %v290_v52, 4  ;;  %v360_v63 = vrot.slane %v359_v53, 4  ;;  %v327_v15 = vrot.slane %v326_v55, 4  ;;  %v333_v17 = vsel %vm286_vm1, %v134_v57, inf  ;;  %p932_p10 = scmp.ne.s32.totalorder %s858_s25, %s931_s26  ;;  %p937_p12 = scmp.lt.s32.totalorder %s931_s26, %s931_s26 }
  0x2a   :  { %212 = vrot.lane.b32.xlu1 %v1039_v6, %s983_s0  ;;  %210 = vrot.lane.b32.xlu0 %v1041_v7, %s983_s0  ;;  %v396_v16 = vrot.slane %v395_v56, 4  ;;  %v334_v18 = vsel %vm288_vm2, %v135_v58, inf  ;;  %v369_v19 = vrot.slane %v368_v59, 4  ;;  %v301_v22 = vmin.f32 %v299_v49, %v300_v60 }
  0x2b   :  { %v292_v23 = vmin.f32 %v290_v52, %v291_v62  ;;  %v361_v24 = vmax.f32 %v359_v53, %v360_v63  ;;  %v335_v26 = vmin.f32 %v333_v17, %v334_v18  ;;  %v328_v27 = vmin.f32 %v326_v55, %v327_v15  ;;  %p938_p13 = por %p937_p12, %p936_p11 }
  0x2c   :  { %v397_v28 = vmax.f32 %v395_v56, %v396_v16  ;;  %v402_v30 = vsel %vm286_vm1, %v134_v57, -inf  ;;  %v403_v31 = vsel %vm288_vm2, %v135_v58, -inf  ;;  %v370_v32 = vmax.f32 %v368_v59, %v369_v19 }
  0x2d   :  { %v302_v33 = vrot.slane %v301_v22, 2  ;;  %v293_v34 = vrot.slane %v292_v23, 2  ;;  %v336_v36 = vrot.slane %v335_v26, 4  ;;  %v404_v37 = vmax.f32 %v402_v30, %v403_v31  ;;  %p939_p0 = pnand %p938_p13, %p932_p10 }
  0x2e   :  { %240 = vrot.lane.b32.xlu1 %v1047_v8, %s983_s0  ;;  %238 = vrot.lane.b32.xlu0 %v1049_v9, %s983_s0  ;;  %v362_v38 = vrot.slane %v361_v24, 2  ;;  %v329_v40 = vrot.slane %v328_v27, 2  ;;  %v398_v41 = vrot.slane %v397_v28, 2  ;;  %v371_v42 = vrot.slane %v370_v32, 2 }
  0x2f   :  { %v303_v43 = vmin.f32 %v301_v22, %v302_v33  ;;  %v149_v44 = vrot.slane %v1047_v8, 7  ;;  %v294_v45 = vmin.f32 %v292_v23, %v293_v34  ;;  %v337_v46 = vmin.f32 %v335_v26, %v336_v36 }
  0x30   :  { %v405_v47 = vrot.slane %v404_v37, 4  ;;  %v148_v48 = vrot.slane %v1049_v9, 7  ;;  %v363_v49 = vmax.f32 %v361_v24, %v362_v38  ;;  %v330_v50 = vmin.f32 %v328_v27, %v329_v40 }
  0x31   :  { %v399_v52 = vmax.f32 %v397_v28, %v398_v41  ;;  %v372_v53 = vmax.f32 %v370_v32, %v371_v42  ;;  %v304_v55 = vrot.slane %v303_v43, 1  ;;  %v295_v56 = vrot.slane %v294_v45, 1 }
  0x32   :  { %244 = vrot.lane.b32.xlu1 %v1055_v10, %s983_s0  ;;  %242 = vrot.lane.b32.xlu0 %v1057_v11, %s983_s0  ;;  %v338_v57 = vrot.slane %v337_v46, 2  ;;  %v406_v58 = vmax.f32 %v404_v37, %v405_v47  ;;  %v150_v59 = vsel %vm93_vm0, %v148_v48, %v149_v44  ;;  %v364_v60 = vrot.slane %v363_v49, 1 }
  0x33   :  { %v331_v62 = vrot.slane %v330_v50, 1  ;;  %v400_v63 = vrot.slane %v399_v52, 1  ;;  %v373_v15 = vrot.slane %v372_v53, 1  ;;  %v178_v16 = vsub.f32 %v1049_v9, %v148_v48 }
  0x34   :  { %v179_v17 = vsub.f32 %v1047_v8, %v150_v59  ;;  %v305_v18 = vmin.f32 %v303_v43, %v304_v55  ;;  %v296_v19 = vmin.f32 %v294_v45, %v295_v56  ;;  %v339_v22 = vmin.f32 %v337_v46, %v338_v57 }
  0x35   :  { %v407_v23 = vrot.slane %v406_v58, 2  ;;  %v365_v24 = vmax.f32 %v363_v49, %v364_v60  ;;  %v332_v26 = vmin.f32 %v330_v50, %v331_v62  ;;  %v401_v27 = vmax.f32 %v399_v52, %v400_v63 }
  0x36   :  { %256 = vrot.lane.b32.xlu1 %v1063_v12, %s983_s0  ;;  %254 = vrot.lane.b32.xlu0 %v1065_v13, %s983_s0  ;;  %v374_v28 = vmax.f32 %v372_v53, %v373_v15  ;;  %v152_v30 = vrot.slane %v1055_v10, 7  ;;  %v151_v31 = vrot.slane %v1057_v11, 7  ;;  %v425_v32 = vsel %vm286_vm1, %v178_v16, inf }
  0x37   :  { %v426_v33 = vsel %vm288_vm2, %v179_v17, inf  ;;  %v493_v34 = vsel %vm286_vm1, %v178_v16, -inf  ;;  %v494_v36 = vsel %vm288_vm2, %v179_v17, -inf  ;;  %v1159_v37 = vsel %vm288_vm2, %v305_v18, inf }
  0x38   :  { %v1162_v38 = vsel %vm288_vm2, %v296_v19, inf  ;;  %v340_v40 = vrot.slane %v339_v22, 1  ;;  %v408_v41 = vmax.f32 %v406_v58, %v407_v23  ;;  %v1165_v42 = vsel %vm288_vm2, %v365_v24, -inf }
  0x39   :  { %1575 = vst [vmem:[#allocation29_spill] sm:$0xff] %v1162_v38  ;;  %1576 = vst [vmem:[#allocation30_spill] sm:$0xff] %v1165_v42  ;;  %v1168_v43 = vsel %vm288_vm2, %v332_v26, inf  ;;  %v1171_v44 = vsel %vm288_vm2, %v401_v27, -inf  ;;  %v161_v45 = vrot.slane %v1063_v12, 7  ;;  %v427_v46 = vmin.f32 %v425_v32, %v426_v33 }
  0x3a   :  { %260 = vrot.lane.b32.xlu1 %v1077_v20, %s983_s0  ;;  %258 = vrot.lane.b32.xlu0 %v1079_v21, %s983_s0  ;;  %1577 = vst [vmem:[#allocation31_spill] sm:$0xff] %v1168_v43  ;;  %1578 = vst [vmem:[#allocation32_spill] sm:$0xff] %v1171_v44  ;;  %v1174_v47 = vmax.f32 %v493_v34, %v494_v36  ;;  %v153_v48 = vsel %vm93_vm0, %v151_v31, %v152_v30  ;;  %v160_v49 = vrot.slane %v1065_v13, 7  ;;  %v1540_v18 = vmov -inf  }
  0x3b   :  { %v180_v50 = vsub.f32 %v1057_v11, %v151_v31  ;;  %v164_v52 = vrot.slane %v1077_v20, 7  ;;  %v163_v53 = vrot.slane %v1079_v21, 7  ;;  %v1182_v55 = vsel %vm288_vm2, %v374_v28, -inf  ;;  %78 = vst.msk [vmem:[#allocation10 + $0x1] sm:$0x1] %vm76_vm3, %v1540_v18 }
  0x3c   :  { %v341_v57 = vmin.f32 %v339_v22, %v340_v40  ;;  %v409_v58 = vrot.slane %v408_v41, 1  ;;  %v181_v59 = vsub.f32 %v1055_v10, %v153_v48  ;;  %v101_v60 = vrot.slane %v1088_v25, 7  ;;  %80 = vst.msk [vmem:[#allocation10 + $0x3] sm:$0x1] %vm76_vm3, %v1540_v18 }
  0x3d   :  { %v100_v62 = vrot.slane %v1093_v29, 7  ;;  %v162_v15 = vsel %vm93_vm0, %v160_v49, %v161_v45  ;;  %v104_v16 = vrot.slane %v1104_v35, 7  ;;  %v103_v17 = vrot.slane %v1109_v39, 7 }
  0x3e   :  { %200 = vrot.lane.b32.xlu1 %v1088_v25, %s983_s0  ;;  %198 = vrot.lane.b32.xlu0 %v1093_v29, %s983_s0  ;;  %v428_v19 = vrot.slane %v427_v46, 4  ;;  %v434_v23 = vsel %vm286_vm1, %v180_v50, inf  ;;  %v165_v24 = vsel %vm93_vm0, %v163_v53, %v164_v52  ;;  %v1202_v26 = vsel %vm288_vm2, %v341_v57, inf }
  0x3f   :  { %v1204_v27 = vmax.f32 %v408_v41, %v409_v58  ;;  %v502_v28 = vsel %vm286_vm1, %v180_v50, -inf  ;;  %v186_v30 = vsub.f32 %v1065_v13, %v160_v49  ;;  %v435_v31 = vsel %vm288_vm2, %v181_v59, inf }
  0x40   :  { %v187_v32 = vsub.f32 %v1063_v12, %v162_v15  ;;  %v188_v33 = vsub.f32 %v1079_v21, %v163_v53  ;;  %v102_v34 = vsel %vm93_vm0, %v100_v62, %v101_v60  ;;  %v189_v36 = vsub.f32 %v1077_v20, %v165_v24 }
  0x41   :  { %v105_v40 = vsel %vm93_vm0, %v103_v17, %v104_v16  ;;  %v155_v45 = vrot.slane %v1125_v51, 7  ;;  %v154_v41 = vrot.slane %v1127_v54, 7  ;;  %v503_v48 = vsel %vm288_vm2, %v181_v59, -inf }
  0x42   :  { %204 = vrot.lane.b32.xlu1 %v1104_v35, %s983_s0  ;;  %202 = vrot.lane.b32.xlu0 %v1109_v39, %s983_s0  ;;  %v128_v49 = vsub.f32 %v1093_v29, %v100_v62  ;;  %v158_v50 = vrot.slane %v1135_v61, 7  ;;  %v157_v52 = vrot.slane %v1137_v14, 7  ;;  %v1220_v57 = vmin.f32 %v427_v46, %v428_v19 }
  0x43   :  { %v461_v53 = vsel %vm286_vm1, %v186_v30, inf  ;;  %v129_v58 = vsub.f32 %v1088_v25, %v102_v34  ;;  %v130_v60 = vsub.f32 %v1109_v39, %v103_v17  ;;  %v462_v15 = vsel %vm288_vm2, %v187_v32, inf }
  0x44   :  { %v529_v16 = vsel %vm286_vm1, %v186_v30, -inf  ;;  %v530_v59 = vsel %vm288_vm2, %v187_v32, -inf  ;;  %v131_v62 = vsub.f32 %v1104_v35, %v105_v40  ;;  %v470_v24 = vsel %vm286_vm1, %v188_v33, inf }
  0x45   :  { %v471_v63 = vsel %vm288_vm2, %v189_v36, inf  ;;  %v538_v46 = vsel %vm286_vm1, %v188_v33, -inf  ;;  %v156_v19 = vsel %vm93_vm0, %v154_v41, %v155_v45  ;;  %v539_v34 = vsel %vm288_vm2, %v189_v36, -inf }
  0x46   :  { %248 = vrot.lane.b32.xlu1 %v1125_v51, %s983_s0  ;;  %246 = vrot.lane.b32.xlu0 %v1127_v54, %s983_s0  ;;  %v306_v17 = vsel %vm286_vm1, %v128_v49, inf  ;;  %v375_v56 = vsel %vm286_vm1, %v128_v49, -inf  ;;  %v159_v30 = vsel %vm93_vm0, %v157_v52, %v158_v50  ;;  %v307_v32 = vsel %vm288_vm2, %v129_v58, inf }
  0x47   :  { %v376_v40 = vsel %vm288_vm2, %v129_v58, -inf  ;;  %v315_v18 = vsel %vm286_vm1, %v130_v60, inf  ;;  %v384_v22 = vsel %vm286_vm1, %v130_v60, -inf  ;;  %v316_v33 = vsel %vm288_vm2, %v131_v62, inf }
  0x48   :  { %v385_v45 = vsel %vm288_vm2, %v131_v62, -inf  ;;  %v182_v36 = vsub.f32 %v1127_v54, %v154_v41  ;;  %v183_v44 = vsub.f32 %v1125_v51, %v156_v19  ;;  %v436_v42 = vmin.f32 %v434_v23, %v435_v31 }
  0x49   :  { %v504_v49 = vmax.f32 %v502_v28, %v503_v48  ;;  %v184_v50 = vsub.f32 %v1137_v14, %v157_v52  ;;  %v185_v43 = vsub.f32 %v1135_v61, %v159_v30  ;;  %v463_v38 = vmin.f32 %v461_v53, %v462_v15 }
  0x4a   :  { %252 = vrot.lane.b32.xlu1 %v1135_v61, %s983_s0  ;;  %250 = vrot.lane.b32.xlu0 %v1137_v14, %s983_s0  ;;  %v531_v58 = vmax.f32 %v529_v16, %v530_v59  ;;  %v472_v39 = vmin.f32 %v470_v24, %v471_v63  ;;  %v540_v35 = vmax.f32 %v538_v46, %v539_v34  ;;  %v443_v62 = vsel %vm286_vm1, %v182_v36, inf }
  0x4b   :  { %v308_v29 = vmin.f32 %v306_v17, %v307_v32  ;;  %v377_v60 = vmax.f32 %v375_v56, %v376_v40  ;;  %v317_v25 = vmin.f32 %v315_v18, %v316_v33  ;;  %v386_v21 = vmax.f32 %v384_v22, %v385_v45 }
  0x4c   :  { %v444_v41 = vsel %vm288_vm2, %v183_v44, inf  ;;  %v511_v19 = vsel %vm286_vm1, %v182_v36, -inf  ;;  %v512_v23 = vsel %vm288_vm2, %v183_v44, -inf  ;;  %v437_v28 = vrot.slane %v436_v42, 4 }
  0x4d   :  { %v505_v31 = vrot.slane %v504_v49, 4  ;;  %v452_v48 = vsel %vm286_vm1, %v184_v50, inf  ;;  %v453_v52 = vsel %vm288_vm2, %v185_v43, inf  ;;  %v464_v63 = vrot.slane %v463_v38, 4 }
  0x4e   :  { %v532_v53 = vrot.slane %v531_v58, 4  ;;  %v473_v15 = vrot.slane %v472_v39, 4  ;;  %v541_v56 = vrot.slane %v540_v35, 4  ;;  %v309_v18 = vrot.slane %v308_v29, 4 }
  0x4f   :  { %v378_v22 = vrot.slane %v377_v60, 4  ;;  %v445_v16 = vmin.f32 %v443_v62, %v444_v41  ;;  %v513_v59 = vmax.f32 %v511_v19, %v512_v23  ;;  %v1579_v24 = vrot.slane %v1174_v47, 4 }
  0x50   :  { %v318_v34 = vrot.slane %v317_v25, 4  ;;  %v387_v44 = vrot.slane %v386_v21, 4  ;;  %v454_v17 = vmin.f32 %v452_v48, %v453_v52  ;;  %v1258_v30 = vsel %vm288_vm2, %v1204_v27, -inf }
  0x51   :  { %v497_v46 = vmax.f32 %v1174_v47, %v1579_v24  ;;  %v430_v32 = vrot.slane %v1220_v57, 2  ;;  %v438_v40 = vmin.f32 %v436_v42, %v437_v28  ;;  %v506_v33 = vmax.f32 %v504_v49, %v505_v31 }
  0x52   :  { %v465_v45 = vmin.f32 %v463_v38, %v464_v63  ;;  %v533_v36 = vmax.f32 %v531_v58, %v532_v53  ;;  %v474_v14 = vmin.f32 %v472_v39, %v473_v15  ;;  %v542_v62 = vmax.f32 %v540_v35, %v541_v56 }
  0x53   :  { %v310_v41 = vmin.f32 %v308_v29, %v309_v18  ;;  %v379_v19 = vmax.f32 %v377_v60, %v378_v22  ;;  %v446_v23 = vrot.slane %v445_v16, 4  ;;  %v514_v61 = vrot.slane %v513_v59, 4 }
  0x54   :  { %v498_v47 = vrot.slane %v497_v46, 2  ;;  %v319_v24 = vmin.f32 %v317_v25, %v318_v34  ;;  %v388_v54 = vmax.f32 %v386_v21, %v387_v44  ;;  %v455_v48 = vrot.slane %v454_v17, 4 }
  0x55   :  { %v439_v52 = vrot.slane %v438_v40, 2  ;;  %v507_v51 = vrot.slane %v506_v33, 2  ;;  %v520_v27 = vsel %vm286_vm1, %v184_v50, -inf  ;;  %v521_v20 = vsel %vm288_vm2, %v185_v43, -inf }
  0x56   :  { %v466_v42 = vrot.slane %v465_v45, 2  ;;  %v534_v49 = vrot.slane %v533_v36, 2  ;;  %v475_v38 = vrot.slane %v474_v14, 2  ;;  %v543_v58 = vrot.slane %v542_v62, 2 }
  0x57   :  { %v311_v39 = vrot.slane %v310_v41, 2  ;;  %v380_v35 = vrot.slane %v379_v19, 2  ;;  %v447_v29 = vmin.f32 %v445_v16, %v446_v23  ;;  %v515_v60 = vmax.f32 %v513_v59, %v514_v61 }
  0x58   :  { %v320_v28 = vrot.slane %v319_v24, 2  ;;  %v389_v31 = vrot.slane %v388_v54, 2  ;;  %v456_v63 = vmin.f32 %v454_v17, %v455_v48  ;;  %v522_v25 = vmax.f32 %v520_v27, %v521_v20 }
  0x59   :  { %v431_v21 = vmin.f32 %v1220_v57, %v430_v32  ;;  %v499_v53 = vmax.f32 %v497_v46, %v498_v47  ;;  %v440_v15 = vmin.f32 %v438_v40, %v439_v52  ;;  %v508_v56 = vmax.f32 %v506_v33, %v507_v51 }
  0x5a   :  { %v467_v50 = vmin.f32 %v465_v45, %v466_v42  ;;  %v535_v18 = vmax.f32 %v533_v36, %v534_v49  ;;  %v476_v43 = vmin.f32 %v474_v14, %v475_v38  ;;  %v544_v22 = vmax.f32 %v542_v62, %v543_v58 }
  0x5b   :  { %v312_v34 = vmin.f32 %v310_v41, %v311_v39  ;;  %v381_v44 = vmax.f32 %v379_v19, %v380_v35  ;;  %v448_v13 = vrot.slane %v447_v29, 2  ;;  %v516_v12 = vrot.slane %v515_v60, 2 }
  0x5c   :  { %v321_v11 = vmin.f32 %v319_v24, %v320_v28  ;;  %v390_v16 = vmax.f32 %v388_v54, %v389_v31  ;;  %v457_v61 = vrot.slane %v456_v63, 2  ;;  %v523_v59 = vrot.slane %v522_v25, 4 }
  0x5d   :  { %v432_v23 = vrot.slane %v431_v21, 1  ;;  %v500_v17 = vrot.slane %v499_v53, 1  ;;  %v441_v20 = vrot.slane %v440_v15, 1  ;;  %v509_v48 = vrot.slane %v508_v56, 1 }
  0x5e   :  { %v468_v57 = vrot.slane %v467_v50, 1  ;;  %v536_v46 = vrot.slane %v535_v18, 1  ;;  %v477_v32 = vrot.slane %v476_v43, 1  ;;  %v545_v51 = vrot.slane %v544_v22, 1 }
  0x5f   :  { %v313_v40 = vrot.slane %v312_v34, 1  ;;  %v382_v33 = vrot.slane %v381_v44, 1  ;;  %v449_v14 = vmin.f32 %v447_v29, %v448_v13  ;;  %v517_v45 = vmax.f32 %v515_v60, %v516_v12 }
  0x60   :  { %v322_v36 = vrot.slane %v321_v11, 1  ;;  %v391_v62 = vrot.slane %v390_v16, 1  ;;  %v458_v41 = vmin.f32 %v456_v63, %v457_v61  ;;  %v524_v19 = vmax.f32 %v522_v25, %v523_v59 }
  0x61   :  { %v433_v47 = vmin.f32 %v431_v21, %v432_v23  ;;  %v501_v54 = vmax.f32 %v499_v53, %v500_v17  ;;  %v442_v24 = vmin.f32 %v440_v15, %v441_v20  ;;  %v510_v52 = vmax.f32 %v508_v56, %v509_v48 }
  0x62   :  { %v469_v27 = vmin.f32 %v467_v50, %v468_v57  ;;  %v537_v42 = vmax.f32 %v535_v18, %v536_v46  ;;  %v478_v49 = vmin.f32 %v476_v43, %v477_v32  ;;  %v546_v38 = vmax.f32 %v544_v22, %v545_v51 }
  0x63   :  { %vm561_vm4 = vcmask 130056   ;;  %v314_v58 = vmin.f32 %v312_v34, %v313_v40  ;;  %v383_v39 = vmax.f32 %v381_v44, %v382_v33  ;;  %v450_v35 = vrot.slane %v449_v14, 1 }
  0x64   :  { %v518_v28 = vrot.slane %v517_v45, 1  ;;  %v323_v31 = vmin.f32 %v321_v11, %v322_v36  ;;  %v392_v13 = vmax.f32 %v390_v16, %v391_v62  ;;  %v459_v12 = vrot.slane %v458_v41, 1 }
  0x65   :  { %v525_v29 = vrot.slane %v524_v19, 2  ;;  %v1265_v60 = vsel %vm288_vm2, %v433_v47, inf  ;;  %v1268_v63 = vsel %vm288_vm2, %v501_v54, -inf  ;;  %v1271_v25 = vsel %vm288_vm2, %v442_v24, inf }
  0x66   :  { %v1274_v21 = vsel %vm288_vm2, %v510_v52, -inf  ;;  %v1277_v53 = vsel %vm288_vm2, %v469_v27, inf  ;;  %v1280_v11 = vsel %vm288_vm2, %v537_v42, -inf  ;;  %v1283_v15 = vsel %vm288_vm2, %v478_v49, inf }
  0x67   :  { %v1286_v56 = vsel %vm288_vm2, %v546_v38, -inf  ;;  %v1289_v50 = vsel %vm288_vm2, %v314_v58, inf  ;;  %v1292_v18 = vsel %vm288_vm2, %v383_v39, -inf  ;;  %v451_v43 = vmin.f32 %v449_v14, %v450_v35 }
  0x68   :  { %v519_v22 = vmax.f32 %v517_v45, %v518_v28  ;;  %v1295_v16 = vsel %vm288_vm2, %v323_v31, inf  ;;  %v1298_v61 = vsel %vm288_vm2, %v392_v13, -inf  ;;  %v460_v59 = vmin.f32 %v458_v41, %v459_v12 }
  0x69   :  { %1580 = vst [vmem:[#allocation33_spill] sm:$0xff] %v1298_v61  ;;  %v526_v23 = vmax.f32 %v524_v19, %v525_v29  ;;  %vm71_vm5 = vcmask 122880  }
  0x6a   :  { %v1322_v14 = vsel %vm288_vm2, %v519_v22, -inf  ;;  %v1325_v62 = vsel %vm288_vm2, %v460_v59, inf }
  0x6b   :  { %1582 = vst [vmem:[#allocation35_spill] sm:$0xff] %v1325_v62  ;;  %v527_v41 = vrot.slane %v526_v23, 1 }
  0x6d   :  { %v528_v12 = vmax.f32 %v526_v23, %v527_v41 }
  0x90   :  { %v195_v34 = vpop.permute.xlu1 %194  ;;  %v191_v44 = vpop.permute.xlu0 %190 }
  0x91   :  { %v228_v48 = vsub.f32 %v1015_v0, %v195_v34  ;;  %v226_v57 = vsub.f32 %v1017_v1, %v191_v44  ;;  %v1319_v1 = vsel %vm288_vm2, %v451_v43, inf }
  0x92   :  { %1581 = vst [vmem:[#allocation34_spill] sm:$0xff] %v1319_v1 }
  0x93   :  { %v571_v54 = vsel %vm561_vm4, %v228_v48, inf  ;;  %v644_v24 = vsel %vm561_vm4, %v228_v48, -inf  ;;  %v562_v52 = vsel %vm561_vm4, %v226_v57, inf  ;;  %v635_v27 = vsel %vm561_vm4, %v226_v57, -inf }
  0x94   :  { %v197_v45 = vpop.permute.xlu1 %196  ;;  %v193_v36 = vpop.permute.xlu0 %192 }
  0x95   :  { %v229_v19 = vsub.f32 %v1023_v2, %v197_v45  ;;  %v227_v47 = vsub.f32 %v1025_v3, %v193_v36 }
  0x97   :  { %v572_v42 = vsel %vm561_vm4, %v229_v19, inf  ;;  %v645_v49 = vsel %vm561_vm4, %v229_v19, -inf  ;;  %v563_v38 = vsel %vm561_vm4, %v227_v47, inf  ;;  %v636_v58 = vsel %vm561_vm4, %v227_v47, -inf }
  0x98   :  { %v573_v39 = vmin.f32 %v571_v54, %v572_v42  ;;  %v646_v2 = vmax.f32 %v644_v24, %v645_v49  ;;  %v564_v35 = vmin.f32 %v562_v52, %v563_v38  ;;  %v637_v3 = vmax.f32 %v635_v27, %v636_v58  ;;  %v209_v28 = vpop.permute.xlu1 %208  ;;  %v207_v31 = vpop.permute.xlu0 %206 }
  0x99   :  { %v235_v29 = vsub.f32 %v1031_v4, %v209_v28  ;;  %v234_v43 = vsub.f32 %v1033_v5, %v207_v31 }
  0x9a   :  { %v574_v22 = vrot.slane %v573_v39, 4  ;;  %v647_v34 = vrot.slane %v646_v2, 4  ;;  %v565_v44 = vrot.slane %v564_v35, 4  ;;  %v638_v59 = vrot.slane %v637_v3, 4 }
  0x9b   :  { %v599_v48 = vsel %vm561_vm4, %v235_v29, inf  ;;  %v672_v57 = vsel %vm561_vm4, %v235_v29, -inf  ;;  %v598_v45 = vsel %vm561_vm4, %v234_v43, inf  ;;  %v671_v36 = vsel %vm561_vm4, %v234_v43, -inf }
  0x9c   :  { %v575_v19 = vmin.f32 %v573_v39, %v574_v22  ;;  %v648_v47 = vmax.f32 %v646_v2, %v647_v34  ;;  %v566_v54 = vmin.f32 %v564_v35, %v565_v44  ;;  %v639_v23 = vmax.f32 %v637_v3, %v638_v59  ;;  %v213_v41 = vpop.permute.xlu1 %212  ;;  %v211_v4 = vpop.permute.xlu0 %210 }
  0x9d   :  { %v600_v24 = vmin.f32 %v598_v45, %v599_v48  ;;  %v673_v5 = vmax.f32 %v671_v36, %v672_v57  ;;  %v237_v52 = vsub.f32 %v1039_v6, %v213_v41  ;;  %v236_v27 = vsub.f32 %v1041_v7, %v211_v4 }
  0x9e   :  { %v576_v42 = vrot.slane %v575_v19, 2  ;;  %v649_v49 = vrot.slane %v648_v47, 2  ;;  %v567_v38 = vrot.slane %v566_v54, 2  ;;  %v640_v58 = vrot.slane %v639_v23, 2 }
  0x9f   :  { %v601_v28 = vrot.slane %v600_v24, 4  ;;  %v674_v31 = vrot.slane %v673_v5, 4  ;;  %v608_v29 = vsel %vm561_vm4, %v237_v52, inf  ;;  %v681_v39 = vsel %vm561_vm4, %v237_v52, -inf }
  0xa0   :  { %v577_v2 = vmin.f32 %v575_v19, %v576_v42  ;;  %v650_v35 = vmax.f32 %v648_v47, %v649_v49  ;;  %v568_v3 = vmin.f32 %v566_v54, %v567_v38  ;;  %v641_v43 = vmax.f32 %v639_v23, %v640_v58  ;;  %v241_v22 = vpop.permute.xlu1 %240  ;;  %v239_v34 = vpop.permute.xlu0 %238 }
  0xa1   :  { %v602_v44 = vmin.f32 %v600_v24, %v601_v28  ;;  %v675_v6 = vmax.f32 %v673_v5, %v674_v31  ;;  %v607_v7 = vsel %vm561_vm4, %v236_v27, inf  ;;  %v680_v59 = vsel %vm561_vm4, %v236_v27, -inf }
  0xa2   :  { %v578_v48 = vrot.slane %v577_v2, 1  ;;  %v651_v57 = vrot.slane %v650_v35, 1  ;;  %v569_v45 = vrot.slane %v568_v3, 1  ;;  %v642_v36 = vrot.slane %v641_v43, 1 }
  0xa3   :  { %v603_v41 = vrot.slane %v602_v44, 2  ;;  %v676_v4 = vrot.slane %v675_v6, 2  ;;  %v609_v13 = vmin.f32 %v607_v7, %v608_v29  ;;  %v682_v52 = vmax.f32 %v680_v59, %v681_v39 }
  0xa4   :  { %v1352_v19 = vsel %vm288_vm2, %v528_v12, -inf  ;;  %v1354_v47 = vmin.f32 %v577_v2, %v578_v48  ;;  %v1356_v54 = vmax.f32 %v650_v35, %v651_v57  ;;  %v1358_v23 = vmin.f32 %v568_v3, %v569_v45  ;;  %v245_v24 = vpop.permute.xlu1 %244  ;;  %v243_v5 = vpop.permute.xlu0 %242  ;;  %v1583_v35 = vld [vmem:[#allocation16_spill] sm:$0xff] }
  0xa5   :  { %v604_v27 = vmin.f32 %v602_v44, %v603_v41  ;;  %v677_v42 = vmax.f32 %v675_v6, %v676_v4  ;;  %v610_v49 = vrot.slane %v609_v13, 4  ;;  %v683_v38 = vrot.slane %v682_v52, 4 }
  0xa6   :  { %v1360_v58 = vmax.f32 %v641_v43, %v642_v36  ;;  %v275_v28 = vsub.f32 %v1047_v8, %v241_v22  ;;  %v274_v31 = vsub.f32 %v1049_v9, %v239_v34  ;;  %v277_v12 = vsub.f32 %v1055_v10, %v245_v24 }
  0xa7   :  { %v605_v29 = vrot.slane %v604_v27, 1  ;;  %v611_v39 = vmin.f32 %v609_v13, %v610_v49  ;;  %v684_v2 = vmax.f32 %v682_v52, %v683_v38  ;;  %v276_v3 = vsub.f32 %v1583_v35, %v243_v5 }
  0xa8   :  { %v708_v7 = vsel %vm561_vm4, %v275_v28, inf  ;;  %v780_v44 = vsel %vm561_vm4, %v275_v28, -inf  ;;  %v707_v6 = vsel %vm561_vm4, %v274_v31, inf  ;;  %v779_v43 = vsel %vm561_vm4, %v274_v31, -inf  ;;  %v257_v59 = vpop.permute.xlu1 %256  ;;  %v255_v10 = vpop.permute.xlu0 %254 }
  0xa9   :  { %v1370_v48 = vmin.f32 %v604_v27, %v605_v29  ;;  %v678_v8 = vrot.slane %v677_v42, 1  ;;  %v612_v9 = vrot.slane %v611_v39, 2  ;;  %v685_v22 = vrot.slane %v684_v2, 2  ;;  %v1584_v29 = vld [vmem:[#allocation17_spill] sm:$0xff] }
  0xaa   :  { %v709_v34 = vmin.f32 %v707_v6, %v708_v7  ;;  %v781_v13 = vmax.f32 %v779_v43, %v780_v44  ;;  %v717_v57 = vsel %vm561_vm4, %v277_v12, inf  ;;  %v789_v45 = vsel %vm561_vm4, %v277_v12, -inf  ;;  %v1585_v7 = vld [vmem:[#allocation18_spill] sm:$0xff] }
  0xab   :  { %v613_v36 = vmin.f32 %v611_v39, %v612_v9  ;;  %v686_v41 = vmax.f32 %v684_v2, %v685_v22  ;;  %v716_v4 = vsel %vm561_vm4, %v276_v3, inf  ;;  %v788_v52 = vsel %vm561_vm4, %v276_v3, -inf }
  0xac   :  { %v710_v24 = vrot.slane %v709_v34, 4  ;;  %v782_v5 = vrot.slane %v781_v13, 4  ;;  %v718_v27 = vmin.f32 %v716_v4, %v717_v57  ;;  %v790_v49 = vmax.f32 %v788_v52, %v789_v45  ;;  %v261_v38 = vpop.permute.xlu1 %260  ;;  %v259_v6 = vpop.permute.xlu0 %258  ;;  %v1586_v52 = vld [vmem:[#allocation19_spill] sm:$0xff] }
  0xad   :  { %v1376_v28 = vmax.f32 %v677_v42, %v678_v8  ;;  %v614_v31 = vrot.slane %v613_v36, 1  ;;  %v283_v35 = vsub.f32 %v1584_v29, %v257_v59  ;;  %v282_v44 = vsub.f32 %v1585_v7, %v255_v10 }
  0xae   :  { %v711_v12 = vmin.f32 %v709_v34, %v710_v24  ;;  %v783_v39 = vmax.f32 %v781_v13, %v782_v5  ;;  %v719_v2 = vrot.slane %v718_v27, 4  ;;  %v791_v43 = vrot.slane %v790_v49, 4  ;;  %v1587_v13 = vld [vmem:[#allocation20_spill] sm:$0xff] }
  0xaf   :  { %v1380_v9 = vmin.f32 %v613_v36, %v614_v31  ;;  %v687_v3 = vrot.slane %v686_v41, 1  ;;  %v744_v22 = vsel %vm561_vm4, %v283_v35, inf  ;;  %v816_v57 = vsel %vm561_vm4, %v283_v35, -inf }
  0xb0   :  { %v712_v45 = vrot.slane %v711_v12, 2  ;;  %v784_v42 = vrot.slane %v783_v39, 2  ;;  %v720_v8 = vmin.f32 %v718_v27, %v719_v2  ;;  %v792_v4 = vmax.f32 %v790_v49, %v791_v43  ;;  %v201_v7 = vpop.permute.xlu1 %200  ;;  %v199_v0 = vpop.permute.xlu0 %198 }
  0xb1   :  { %v743_v59 = vsel %vm561_vm4, %v282_v44, inf  ;;  %v815_v10 = vsel %vm561_vm4, %v282_v44, -inf  ;;  %v285_v34 = vsub.f32 %v1586_v52, %v261_v38  ;;  %v284_v24 = vsub.f32 %v1587_v13, %v259_v6 }
  0xb2   :  { %v713_v5 = vmin.f32 %v711_v12, %v712_v45  ;;  %v785_v36 = vmax.f32 %v783_v39, %v784_v42  ;;  %v721_v31 = vrot.slane %v720_v8, 2  ;;  %v793_v29 = vrot.slane %v792_v4, 2 }
  0xb3   :  { %v745_v33 = vmin.f32 %v743_v59, %v744_v22  ;;  %v817_v35 = vmax.f32 %v815_v10, %v816_v57  ;;  %v753_v32 = vsel %vm561_vm4, %v285_v34, inf  ;;  %v825_v27 = vsel %vm561_vm4, %v285_v34, -inf }
  0xb4   :  { %v714_v49 = vrot.slane %v713_v5, 1  ;;  %v786_v2 = vrot.slane %v785_v36, 1  ;;  %v722_v43 = vmin.f32 %v720_v8, %v721_v31  ;;  %v794_v44 = vmax.f32 %v792_v4, %v793_v29  ;;  %v1588_v4 = vld [vmem:[#allocation21_spill] sm:$0xff]  ;;  %v1589_v31 = vld [vmem:[#allocation22_spill] sm:$0xff]  ;;  %v205_v46 = vpop.permute.xlu1 %204 }
  0xb5   :  { %v746_v40 = vrot.slane %v745_v33, 4  ;;  %v818_v38 = vrot.slane %v817_v35, 4  ;;  %v752_v6 = vsel %vm561_vm4, %v284_v24, inf  ;;  %v824_v12 = vsel %vm561_vm4, %v284_v24, -inf  ;;  %v203_v24 = vpop.permute.xlu0 %202 }
  0xb6   :  { %v1392_v39 = vmax.f32 %v686_v41, %v687_v3  ;;  %v1394_v45 = vmin.f32 %v713_v5, %v714_v49  ;;  %v1396_v22 = vmax.f32 %v785_v36, %v786_v2  ;;  %v723_v57 = vrot.slane %v722_v43, 1 }
  0xb7   :  { %v747_v42 = vmin.f32 %v745_v33, %v746_v40  ;;  %v819_v59 = vmax.f32 %v817_v35, %v818_v38  ;;  %v754_v10 = vmin.f32 %v752_v6, %v753_v32  ;;  %v826_v52 = vmax.f32 %v824_v12, %v825_v27  ;;  %v1590_v38 = vld [vmem:[#allocation23_spill] sm:$0xff]  ;;  %v1591_v12 = vld [vmem:[#allocation24_spill] sm:$0xff] }
  0xb8   :  { %v1398_v34 = vmin.f32 %v722_v43, %v723_v57  ;;  %v795_v8 = vrot.slane %v794_v44, 1  ;;  %v231_v13 = vsub.f32 %v1588_v4, %v201_v7  ;;  %v230_v29 = vsub.f32 %v1589_v31, %v199_v0 }
  0xb9   :  { %v748_v41 = vrot.slane %v747_v42, 2  ;;  %v820_v3 = vrot.slane %v819_v59, 2  ;;  %v755_v5 = vrot.slane %v754_v10, 4  ;;  %v827_v49 = vrot.slane %v826_v52, 4 }
  0xba   :  { %v581_v36 = vsel %vm561_vm4, %v231_v13, inf  ;;  %v654_v40 = vsel %vm561_vm4, %v231_v13, -inf  ;;  %v580_v32 = vsel %vm561_vm4, %v230_v29, inf  ;;  %v653_v33 = vsel %vm561_vm4, %v230_v29, -inf }
  0xbb   :  { %v749_v35 = vmin.f32 %v747_v42, %v748_v41  ;;  %v821_v27 = vmax.f32 %v819_v59, %v820_v3  ;;  %v756_v2 = vmin.f32 %v754_v10, %v755_v5  ;;  %v828_v7 = vmax.f32 %v826_v52, %v827_v49  ;;  %v249_v42 = vpop.permute.xlu1 %248  ;;  %v247_v59 = vpop.permute.xlu0 %246 }
  0xbc   :  { %v582_v43 = vmin.f32 %v580_v32, %v581_v36  ;;  %v655_v0 = vmax.f32 %v653_v33, %v654_v40  ;;  %v233_v6 = vsub.f32 %v1590_v38, %v205_v46  ;;  %v232_v57 = vsub.f32 %v1591_v12, %v203_v24 }
  0xbd   :  { %v750_v4 = vrot.slane %v749_v35, 1  ;;  %v822_v31 = vrot.slane %v821_v27, 1  ;;  %v757_v51 = vrot.slane %v756_v2, 2  ;;  %v829_v20 = vrot.slane %v828_v7, 2 }
  0xbe   :  { %v583_v17 = vrot.slane %v582_v43, 4  ;;  %v656_v13 = vrot.slane %v655_v0, 4  ;;  %v590_v62 = vsel %vm561_vm4, %v233_v6, inf  ;;  %v663_v29 = vsel %vm561_vm4, %v233_v6, -inf }
  0xbf   :  { %v1410_v10 = vmax.f32 %v794_v44, %v795_v8  ;;  %v1412_v52 = vmin.f32 %v749_v35, %v750_v4  ;;  %v758_v41 = vmin.f32 %v756_v2, %v757_v51  ;;  %v1414_v46 = vmax.f32 %v828_v7, %v829_v20  ;;  %v1592_v44 = vld [vmem:[#allocation25_spill] sm:$0xff]  ;;  %v1593_v35 = vld [vmem:[#allocation26_spill] sm:$0xff] }
  0xc0   :  { %v584_v24 = vmin.f32 %v582_v43, %v583_v17  ;;  %v657_v3 = vmax.f32 %v655_v0, %v656_v13  ;;  %v589_v5 = vsel %vm561_vm4, %v232_v57, inf  ;;  %v662_v49 = vsel %vm561_vm4, %v232_v57, -inf  ;;  %v251_v57 = vpop.permute.xlu0 %250 }
  0xc1   :  { %v1418_v36 = vmax.f32 %v821_v27, %v822_v31  ;;  %v759_v40 = vrot.slane %v758_v41, 1  ;;  %v591_v32 = vmin.f32 %v589_v5, %v590_v62  ;;  %v664_v33 = vmax.f32 %v662_v49, %v663_v29  ;;  %v253_v62 = vpop.permute.xlu1 %252 }
  0xc2   :  { %v585_v38 = vrot.slane %v584_v24, 2  ;;  %v658_v6 = vrot.slane %v657_v3, 2  ;;  %v279_v8 = vsub.f32 %v1592_v44, %v249_v42  ;;  %v278_v12 = vsub.f32 %v1593_v35, %v247_v59 }
  0xc3   :  { %v1422_v51 = vmin.f32 %v758_v41, %v759_v40  ;;  %v831_v17 = vrot.slane %v1414_v46, 1  ;;  %v592_v20 = vrot.slane %v591_v32, 4  ;;  %v665_v2 = vrot.slane %v664_v33, 4 }
  0xc4   :  { %v586_v7 = vmin.f32 %v584_v24, %v585_v38  ;;  %v659_v43 = vmax.f32 %v657_v3, %v658_v6  ;;  %v726_v27 = vsel %vm561_vm4, %v279_v8, inf  ;;  %v798_v0 = vsel %vm561_vm4, %v279_v8, -inf  ;;  %v1594_v24 = vld [vmem:[#allocation27_spill] sm:$0xff]  ;;  %v1595_v38 = vld [vmem:[#allocation28_spill] sm:$0xff] }
  0xc5   :  { %v593_v4 = vmin.f32 %v591_v32, %v592_v20  ;;  %v666_v31 = vmax.f32 %v664_v33, %v665_v2  ;;  %v725_v13 = vsel %vm561_vm4, %v278_v12, inf  ;;  %v797_v29 = vsel %vm561_vm4, %v278_v12, -inf }
  0xc6   :  { %v587_v42 = vrot.slane %v586_v7, 1  ;;  %v660_v59 = vrot.slane %v659_v43, 1  ;;  %v727_v41 = vmin.f32 %v725_v13, %v726_v27  ;;  %v799_v5 = vmax.f32 %v797_v29, %v798_v0 }
  0xc7   :  { %v594_v49 = vrot.slane %v593_v4, 2  ;;  %v667_v40 = vrot.slane %v666_v31, 2  ;;  %v281_v3 = vsub.f32 %v1594_v24, %v253_v62  ;;  %v280_v6 = vsub.f32 %v1595_v38, %v251_v57 }
  0xc8   :  { %v728_v44 = vrot.slane %v727_v41, 4  ;;  %v800_v8 = vrot.slane %v799_v5, 4  ;;  %v661_v35 = vmax.f32 %v659_v43, %v660_v59  ;;  %v689_v32 = vsel %vm561_vm4, %v1360_v58, -inf }
  0xc9   :  { %v595_v33 = vmin.f32 %v593_v4, %v594_v49  ;;  %v668_v20 = vmax.f32 %v666_v31, %v667_v40  ;;  %v735_v12 = vsel %vm561_vm4, %v281_v3, inf  ;;  %v807_v2 = vsel %vm561_vm4, %v281_v3, -inf }
  0xca   :  { %v729_v27 = vmin.f32 %v727_v41, %v728_v44  ;;  %v801_v0 = vmax.f32 %v799_v5, %v800_v8  ;;  %v734_v13 = vsel %vm561_vm4, %v280_v6, inf  ;;  %v806_v62 = vsel %vm561_vm4, %v280_v6, -inf }
  0xcb   :  { %v596_v29 = vrot.slane %v595_v33, 1  ;;  %v669_v57 = vrot.slane %v668_v20, 1  ;;  %v736_v24 = vmin.f32 %v734_v13, %v735_v12  ;;  %v808_v38 = vmax.f32 %v806_v62, %v807_v2 }
  0xcc   :  { %v730_v43 = vrot.slane %v729_v27, 2  ;;  %v802_v59 = vrot.slane %v801_v0, 2  ;;  %v690_v58 = vsel %vm561_vm4, %v1356_v54, -inf  ;;  %v691_v4 = vsel %vm561_vm4, %v661_v35, -inf }
  0xcd   :  { %v737_v31 = vrot.slane %v736_v24, 4  ;;  %v809_v49 = vrot.slane %v808_v38, 4  ;;  %v670_v40 = vmax.f32 %v668_v20, %v669_v57  ;;  %v693_v41 = vsel %vm561_vm4, %v1376_v28, -inf }
  0xce   :  { %v731_v5 = vmin.f32 %v729_v27, %v730_v43  ;;  %v803_v3 = vmax.f32 %v801_v0, %v802_v59  ;;  %v694_v6 = vmax.f32 %v689_v32, %v693_v41  ;;  %v695_v44 = vsel %vm561_vm4, %v1392_v39, -inf }
  0xcf   :  { %v738_v8 = vmin.f32 %v736_v24, %v737_v31  ;;  %v810_v12 = vmax.f32 %v808_v38, %v809_v49  ;;  %v692_v2 = vsel %vm561_vm4, %v670_v40, -inf  ;;  %v696_v13 = vmax.f32 %v690_v58, %v695_v44 }
  0xd0   :  { %v832_v54 = vmax.f32 %v1414_v46, %v831_v17  ;;  %v804_v35 = vrot.slane %v803_v3, 1  ;;  %v698_v62 = vmax.f32 %v691_v4, %v692_v2  ;;  %v588_v1 = vmin.f32 %v586_v7, %v587_v42 }
  0xd1   :  { %v739_v20 = vrot.slane %v738_v8, 2  ;;  %v811_v57 = vrot.slane %v810_v12, 2  ;;  %v697_v61 = vmax.f32 %v694_v6, %v696_v13  ;;  %v597_v28 = vmin.f32 %v595_v33, %v596_v29 }
  0xd2   :  { %v732_v27 = vrot.slane %v731_v5, 1  ;;  %v616_v32 = vsel %vm561_vm4, %v1358_v23, inf  ;;  %v617_v39 = vsel %vm561_vm4, %v1354_v47, inf  ;;  %v620_v0 = vsel %vm561_vm4, %v1370_v48, inf }
  0xd3   :  { %v740_v24 = vmin.f32 %v738_v8, %v739_v20  ;;  %v812_v38 = vmax.f32 %v810_v12, %v811_v57  ;;  %v699_v46 = vmax.f32 %v697_v61, %v698_v62  ;;  %v619_v17 = vsel %vm561_vm4, %v597_v28, inf  ;;  %v1598_v20 = vld [vmem:[#allocation29_spill] sm:$0xff]  ;;  %v1599_v57 = vld [vmem:[#allocation31_spill] sm:$0xff] }
  0xd4   :  { %v618_v7 = vsel %vm561_vm4, %v588_v1, inf  ;;  %v621_v42 = vmin.f32 %v616_v32, %v620_v0  ;;  %v622_v33 = vsel %vm561_vm4, %v1380_v9, inf  ;;  %v805_v29 = vmax.f32 %v803_v3, %v804_v35  ;;  %v1602_v0 = vld [vmem:[#allocation30_spill] sm:$0xff] }
  0xd5   :  { %v741_v43 = vrot.slane %v740_v24, 1  ;;  %v813_v23 = vrot.slane %v812_v38, 1  ;;  %702 = vrot.lane.b32.xlu1 %v699_v46, %s985_s1  ;;  %v623_v47 = vmin.f32 %v617_v39, %v622_v33  ;;  %v625_v59 = vmin.f32 %v618_v7, %v619_v17 }
  0xd6   :  { %v833_v48 = vsel %vm561_vm4, %v1396_v22, -inf  ;;  %v834_v61 = vsel %vm561_vm4, %v1410_v10, -inf  ;;  %v837_v1 = vsel %vm561_vm4, %v1418_v36, -inf  ;;  %v839_v58 = vsel %vm561_vm4, %v832_v54, -inf }
  0xd7   :  { %v624_v9 = vmin.f32 %v621_v42, %v623_v47  ;;  %v814_v4 = vmax.f32 %v812_v38, %v813_v23  ;;  %v835_v31 = vsel %vm561_vm4, %v805_v29, -inf  ;;  %v840_v49 = vmax.f32 %v834_v61, %v839_v58  ;;  %v1613_v29 = vld [vmem:[#allocation35_spill] sm:$0xff] }
  0xd8   :  { %v838_v40 = vmax.f32 %v833_v48, %v837_v1  ;;  %v733_v41 = vmin.f32 %v731_v5, %v732_v27  ;;  %v742_v3 = vmin.f32 %v740_v24, %v741_v43  ;;  %v761_v6 = vsel %vm561_vm4, %v1394_v45, inf  ;;  %v1603_v24 = vld [vmem:[#allocation32_spill] sm:$0xff] }
  0xd9   :  { %v626_v22 = vmin.f32 %v624_v9, %v625_v59  ;;  %v836_v44 = vsel %vm561_vm4, %v814_v4, -inf  ;;  %v762_v10 = vsel %vm561_vm4, %v1398_v34, inf  ;;  %v765_v36 = vsel %vm561_vm4, %v1412_v52, inf }
  0xda   :  { %v841_v8 = vmax.f32 %v838_v40, %v840_v49  ;;  %v842_v12 = vmax.f32 %v835_v31, %v836_v44  ;;  %v763_v2 = vsel %vm561_vm4, %v733_v41, inf  ;;  %v764_v13 = vsel %vm561_vm4, %v742_v3, inf }
  0xdb   :  { %629 = vrot.lane.b32.xlu0 %v626_v22, %s985_s1  ;;  %v766_v5 = vmin.f32 %v761_v6, %v765_v36  ;;  %v767_v45 = vsel %vm561_vm4, %v1422_v51, inf  ;;  %v770_v62 = vmin.f32 %v763_v2, %v764_v13  ;;  %v986_v34 = vmov inf  }
  0xdc   :  { %v843_v54 = vmax.f32 %v841_v8, %v842_v12  ;;  %v768_v35 = vmin.f32 %v762_v10, %v767_v45  ;;  %77 = vst.msk [vmem:[#allocation10] sm:$0x1] %vm76_vm3, %v986_v34  ;;  %79 = vst.msk [vmem:[#allocation10 + $0x2] sm:$0x1] %vm76_vm3, %v986_v34  ;;  %v1596_v52 = vmov -inf   ;;  %v1597_v51 = vmin.f32 %v1159_v37, %v1202_v26 }
  0xdd   :  { %72 = vst.msk [vmem:[#allocation9] sm:$0x1] %vm71_vm5, %v986_v34  ;;  %73 = vst.msk [vmem:[#allocation9 + $0x1] sm:$0x1] %vm71_vm5, %v1596_v52  ;;  %v1600_v28 = vmin.f32 %v1598_v20, %v1599_v57  ;;  %v556_v32 = vmax.f32 %v1322_v14, %v1352_v19  ;;  %v1601_v39 = vmax.f32 %v1182_v55, %v1258_v30 }
  0xde   :  { %74 = vst.msk [vmem:[#allocation9 + $0x2] sm:$0x1] %vm71_vm5, %v986_v34  ;;  %75 = vst.msk [vmem:[#allocation9 + $0x3] sm:$0x1] %vm71_vm5, %v1596_v52  ;;  %v1604_v38 = vmax.f32 %v1602_v0, %v1603_v24  ;;  %v1605_v17 = vmin.f32 %v1271_v25, %v1283_v15  ;;  %v1606_v37 = vmin.f32 %v1265_v60, %v1277_v53  ;;  %846 = vrot.lane.b32.xlu1 %v843_v54, %s985_s1  ;;  %v1610_v25 = vld [vmem:[#allocation33_spill] sm:$0xff]  ;;  %v1612_v53 = vld [vmem:[#allocation34_spill] sm:$0xff] }
  0xdf   :  { %v350_v27 = vmin.f32 %v1600_v28, %v1597_v51  ;;  %v1607_v7 = vmax.f32 %v1274_v21, %v1286_v56  ;;  %v1608_v14 = vmax.f32 %v1268_v63, %v1280_v11  ;;  %v769_v55 = vmin.f32 %v766_v5, %v768_v35 }
  0xe0   :  { %v419_v46 = vmax.f32 %v1604_v38, %v1601_v39  ;;  %v487_v26 = vmin.f32 %v1606_v37, %v1605_v17  ;;  %v1609_v42 = vmin.f32 %v1289_v50, %v1295_v16  ;;  %v1611_v15 = vmax.f32 %v1292_v18, %v1610_v25 }
  0xe1   :  { %v555_v19 = vmax.f32 %v1608_v14, %v1607_v7  ;;  %v771_v30 = vmin.f32 %v769_v55, %v770_v62  ;;  %v1614_v43 = vmin.f32 %v1612_v53, %v1613_v29 }
  0xe2   :  { %v352_v33 = vmin.f32 %v350_v27, %v1609_v42  ;;  %v421_v60 = vmax.f32 %v419_v46, %v1611_v15 }
  0xe3   :  { %v489_v21 = vmin.f32 %v487_v26, %v1614_v43  ;;  %v557_v56 = vmax.f32 %v555_v19, %v556_v32  ;;  %774 = vrot.lane.b32.xlu0 %v771_v30, %s985_s1 }
  0xe4   :  { %v353_v63 = vld [vmem:[#allocation9] sm:$0x1]  ;;  %v422_v23 = vld [vmem:[#allocation9 + $0x1] sm:$0x1] }
  0xe5   :  { %v354_v11 = vmin.f32 %v353_v63, %v352_v33  ;;  %v490_v47 = vld [vmem:[#allocation9 + $0x2] sm:$0x1]  ;;  %v558_v59 = vld [vmem:[#allocation9 + $0x3] sm:$0x1]  ;;  %v423_v50 = vmax.f32 %v422_v23, %v421_v60 }
  0xe6   :  { %v491_v16 = vmin.f32 %v490_v47, %v489_v21  ;;  %v559_v48 = vmax.f32 %v558_v59, %v557_v56 }
  0xe7   :  { %356 = vst.msk [vmem:[#allocation9] sm:$0x1] %vm71_vm5, %v354_v11  ;;  %424 = vst.msk [vmem:[#allocation9 + $0x1] sm:$0x1] %vm71_vm5, %v423_v50 }
  0xe8   :  { %492 = vst.msk [vmem:[#allocation9 + $0x2] sm:$0x1] %vm71_vm5, %v491_v16  ;;  %560 = vst.msk [vmem:[#allocation9 + $0x3] sm:$0x1] %vm71_vm5, %v559_v48 }
  0xe9   :  { %942 = shalt.err (!%p939_p0)
}
  0xea   :  { %860 = dma.vmem_to_hbm [thread:$0]  %s858_s25, 64, %s1538_s2, [#allocation6]   ;;  %v700_v18 = vld [vmem:[#allocation10 + $0x1] sm:$0x1]  ;;  %v627_v58 = vld [vmem:[#allocation10] sm:$0x1] }
  0xeb   :  { %v844_v31 = vld [vmem:[#allocation10 + $0x3] sm:$0x1]  ;;  %v772_v41 = vld [vmem:[#allocation10 + $0x2] sm:$0x1]  ;;  %s988_s29 = smov [#allocation10]  }
  0xec   :  { %s867_s30 = sshll.u32 %s988_s29, 4  ;;  %s868_s30 = int_to_ptr.vmem [resolvable:$true] %s867_s30 }
  0xed   :  { %s951_s2 = scalar_lea.vmem %s868_s30, 64  ;;  %p956_p2 = scmp.lt.s32.totalorder %s868_s30, %s868_s30 }
  0xee   :  { %p952_p1 = scmp.ne.s32.totalorder %s868_s30, %s951_s2  ;;  %p957_p3 = scmp.lt.s32.totalorder %s951_s2, %s951_s2 }
  0xf0   :  { %p958_p4 = por %p957_p3, %p956_p2 }
  0xf2   :  { %p959_p5 = pnand %p958_p4, %p952_p1 }
 0x147   :  { %v703_v61 = vpop.permute.xlu1 %702 }
 0x148   :  { %v705_v1 = vmax.f32 %v700_v18, %v703_v61 }
 0x14a   :  { %706 = vst.msk [vmem:[#allocation10 + $0x1] sm:$0x1] %vm76_vm3, %v705_v1 }
 0x14d   :  { %v630_v9 = vpop.permute.xlu0 %629 }
 0x14e   :  { %v632_v4 = vmin.f32 %v627_v58, %v630_v9 }
 0x150   :  { %634 = vst.msk [vmem:[#allocation10] sm:$0x1] %vm76_vm3, %v632_v4  ;;  %v847_v49 = vpop.permute.xlu1 %846 }
 0x151   :  { %v849_v40 = vmax.f32 %v844_v31, %v847_v49 }
 0x153   :  { %850 = vst.msk [vmem:[#allocation10 + $0x3] sm:$0x1] %vm76_vm3, %v849_v40 }
 0x155   :  { %v775_v3 = vpop.permute.xlu0 %774 }
 0x156   :  { %v777_v6 = vmin.f32 %v772_v41, %v775_v3 }
 0x158   :  { %778 = vst.msk [vmem:[#allocation10 + $0x2] sm:$0x1] %vm76_vm3, %v777_v6 }
 0x159   :  { %962 = shalt.err (!%p959_p5)
}
 0x15a   :  { %870 = dma.vmem_to_hbm [thread:$0]  %s868_s30, 64, %s1539_s3, [#allocation11]  }
 0x15b   :  { %975 = dma.done.wait [#allocation6], 64  }
 0x15c   :  { %976 = vsyncadd [#allocation6], 4294967232 }
 0x15d   :  { %977 = dma.done.wait [#allocation11], 64  }
 0x15e   :  { %978 = vsyncadd [#allocation11], 4294967232 }
 0x15f   :  { %877 = vsyncpa [#allocation5], 1 }
 0x160   :  { %878 = vsyncpa [#allocation8], 1 }
 0x161   :  { %879 = vsyncpa [#allocation6], 1 }
 0x162   :  { %880 = vsyncpa [#allocation11], 1 }

</bundles_post_ra>
